<compile_context>
chip_gen: v7x
topology: tpu7x:2x2x1
jax: 0.10.0
libtpu: 0.0.40
codegen_flags: <defaults>
</compile_context>

<pallas_src>
import functools

import jax
import jax.numpy as jnp
from jax.experimental import pallas as pl
from jax.experimental.pallas import tpu as pltpu


# ---------------------------------------------------------------------------
# Kernel: full cascade of BiLSTM(+Linear) blocks for one batch element.
# ---------------------------------------------------------------------------
def _cascade_bilstm_kernel(x_ref, wih_f_ref, whh_f_ref, bf_ref,
                           wih_b_ref, whh_b_ref, bb_ref,
                           wfc_ref, bfc_ref, o_ref,
                           gxf_ref, gxb_ref, hsf_ref, hsb_ref, hc_ref, act_ref,
                           *, L, T, D, H):
    """Shapes (per grid step = one batch element):
      x_ref     : (1, T, D)
      wih_{f,b} : (L, D, 4H)    whh_{f,b}: (L, H, 4H)    b_{f,b}: (L, 1, 4H)
      wfc       : (L, 2H, D)    bfc: (L, 1, D)
      o_ref     : (1, T, D)
      scratch   : gx{f,b} (T,4H), hs{f,b} (T,H), hc (2,1,H), act (T,D)
    """
    act_ref[...] = x_ref[0].astype(jnp.float32)

    for l in range(L):                                   # static, small
        x = act_ref[...]                                 # (T, D)
        # Input projections for all timesteps at once (MXU), hoisted out of
        # the sequential recurrence.
        gxf_ref[...] = jnp.dot(x, wih_f_ref[l],
                               preferred_element_type=jnp.float32) + bf_ref[l]
        gxb_ref[...] = jnp.dot(x, wih_b_ref[l],
                               preferred_element_type=jnp.float32) + bb_ref[l]

        def lstm_cell(gates_row, whh, hseq_ref, t):
            # gates_row: (1, 4H); PyTorch gate order [i, f, g, o].
            g = gates_row + jnp.dot(hc_ref[0], whh,
                                    preferred_element_type=jnp.float32)
            i_g = jax.nn.sigmoid(g[:, 0:H])
            f_g = jax.nn.sigmoid(g[:, H:2 * H])
            g_g = jnp.tanh(g[:, 2 * H:3 * H])
            o_g = jax.nn.sigmoid(g[:, 3 * H:4 * H])
            c_new = f_g * hc_ref[1] + i_g * g_g
            h_new = o_g * jnp.tanh(c_new)
            hc_ref[0] = h_new
            hc_ref[1] = c_new
            hseq_ref[pl.ds(t, 1), :] = h_new

        # --- forward direction ---
        hc_ref[...] = jnp.zeros_like(hc_ref)

        @pl.loop(0, T)
        def _(t):
            lstm_cell(gxf_ref[pl.ds(t, 1), :], whh_f_ref[l], hsf_ref, t)

        # --- backward direction ---
        hc_ref[...] = jnp.zeros_like(hc_ref)

        @pl.loop(0, T)
        def _(s):
            t = T - 1 - s
            lstm_cell(gxb_ref[pl.ds(t, 1), :], whh_b_ref[l], hsb_ref, t)

        # FC on concat(h_fwd, h_bwd): split into two matmuls (avoids a lane
        # concatenation / relayout in VMEM).
        wfc_l = wfc_ref[l]                               # (2H, D)
        y = (jnp.dot(hsf_ref[...], wfc_l[0:H, :],
                     preferred_element_type=jnp.float32)
             + jnp.dot(hsb_ref[...], wfc_l[H:2 * H, :],
                       preferred_element_type=jnp.float32)
             + bfc_ref[l])
        act_ref[...] = y                                 # next layer's input

    o_ref[0] = act_ref[...].astype(o_ref.dtype)


def _cascade_bilstm(x, params):
    """x: (B, T, D) -> (B, T, D), running the full cascade in one pallas_call."""
    wih_f, whh_f, b_f, wih_b, whh_b, b_b, wfc, bfc = params
    L, D, H4 = wih_f.shape
    H = H4 // 4
    B, T, Din = x.shape
    assert Din == D, f"input feature dim {Din} must equal cascade width {D}"

    kernel = functools.partial(_cascade_bilstm_kernel, L=L, T=T, D=D, H=H)
    const3 = lambda b: (0, 0, 0)

    return pl.pallas_call(
        kernel,
        out_shape=jax.ShapeDtypeStruct((B, T, D), jnp.float32),
        grid_spec=pltpu.PrefetchScalarGridSpec(
            num_scalar_prefetch=0,
            grid=(B,),
            in_specs=[
                pl.BlockSpec((1, T, D), lambda b: (b, 0, 0)),      # x
                pl.BlockSpec((L, D, 4 * H), const3),               # W_ih fwd
                pl.BlockSpec((L, H, 4 * H), const3),               # W_hh fwd
                pl.BlockSpec((L, 1, 4 * H), const3),               # b   fwd
                pl.BlockSpec((L, D, 4 * H), const3),               # W_ih bwd
                pl.BlockSpec((L, H, 4 * H), const3),               # W_hh bwd
                pl.BlockSpec((L, 1, 4 * H), const3),               # b   bwd
                pl.BlockSpec((L, 2 * H, D), const3),               # W_fc
                pl.BlockSpec((L, 1, D), const3),                   # b_fc
            ],
            out_specs=pl.BlockSpec((1, T, D), lambda b: (b, 0, 0)),
            scratch_shapes=[
                pltpu.VMEM((T, 4 * H), jnp.float32),   # gates fwd (all t)
                pltpu.VMEM((T, 4 * H), jnp.float32),   # gates bwd (all t)
                pltpu.VMEM((T, H), jnp.float32),       # h sequence fwd
                pltpu.VMEM((T, H), jnp.float32),       # h sequence bwd
                pltpu.VMEM((2, 1, H), jnp.float32),    # (h, c) recurrent state
                pltpu.VMEM((T, D), jnp.float32),       # layer activation
            ],
        ),
        compiler_params=pltpu.CompilerParams(
            dimension_semantics=("parallel",),
            vmem_limit_bytes=64 * 1024 * 1024,
        ),
    )(x.astype(jnp.float32), wih_f, whh_f, b_f, wih_b, whh_b, b_b, wfc, bfc)


# ---------------------------------------------------------------------------
# Parameter init (kaiming-normal weights, zero biases) and forward wrapper.
# ---------------------------------------------------------------------------
def init_cascade_params(key, input_size, hidden_size, repeat):
    """Stacked params of `repeat` BidirectionalLSTM(input, hidden, input) blocks."""
    D, H, L = input_size, hidden_size, repeat

    def kaiming(k, shape, fan_in):
        return ((2.0 / fan_in) ** 0.5) * jax.random.normal(k, shape, jnp.float32)

    wih_f, whh_f, wih_b, whh_b, wfc = [], [], [], [], []
    for l in range(L):
        key, k0, k1, k2, k3, k4 = jax.random.split(key, 6)
        wih_f.append(kaiming(k0, (D, 4 * H), D))       # torch (4H,D) transposed
        whh_f.append(kaiming(k1, (H, 4 * H), H))
        wih_b.append(kaiming(k2, (D, 4 * H), D))
        whh_b.append(kaiming(k3, (H, 4 * H), H))
        wfc.append(kaiming(k4, (2 * H, D), 2 * H))     # torch (D,2H) transposed
    return (
        jnp.stack(wih_f), jnp.stack(whh_f), jnp.zeros((L, 1, 4 * H), jnp.float32),
        jnp.stack(wih_b), jnp.stack(whh_b), jnp.zeros((L, 1, 4 * H), jnp.float32),
        jnp.stack(wfc), jnp.zeros((L, 1, D), jnp.float32),
    )


def cascade_rnn_forward(x, params, mode=1):
    """Matches CascadeRNN.forward (mask path unsupported, see TODO above).

    mode 1: x [B, T, D]    -> [B, T, D]
    mode 0: x [B, C, H, W] -> [B, C, 1, H*W]
    """
    if mode:
        return _cascade_bilstm(x, params)
    B, C, Hs, Ws = x.shape
    seq = jnp.transpose(x.reshape(B, C, Hs * Ws), (0, 2, 1))   # (B, H*W, C)
    out = _cascade_bilstm(seq, params)                         # (B, H*W, C)
    return jnp.transpose(out, (0, 2, 1))[:, :, None, :]        # (B, C, 1, H*W)


# ---------------------------------------------------------------------------
# Pure-JAX reference (same math) for a correctness self-check.
# ---------------------------------------------------------------------------
def _reference_cascade(x, params):
    wih_f, whh_f, b_f, wih_b, whh_b, b_b, wfc, bfc = params
    L = wih_f.shape[0]
    H = whh_f.shape[1]

    def lstm_dir(seq, wih, whh, b, reverse):
        B, T, _ = seq.shape
        gx = jnp.einsum('btd,dk->btk', seq, wih) + b
        h = jnp.zeros((B, H), jnp.float32)
        c = jnp.zeros((B, H), jnp.float32)
        hs = [None] * T
        order = range(T - 1, -1, -1) if reverse else range(T)
        for t in order:
            g = gx[:, t] + h @ whh
            i_g = jax.nn.sigmoid(g[:, 0:H])
            f_g = jax.nn.sigmoid(g[:, H:2 * H])
            g_g = jnp.tanh(g[:, 2 * H:3 * H])
            o_g = jax.nn.sigmoid(g[:, 3 * H:4 * H])
            c = f_g * c + i_g * g_g
            h = o_g * jnp.tanh(c)
            hs[t] = h
        return jnp.stack(hs, axis=1)

    cur = x.astype(jnp.float32)
    for l in range(L):
        hf = lstm_dir(cur, wih_f[l], whh_f[l], b_f[l], False)
        hb = lstm_dir(cur, wih_b[l], whh_b[l], b_b[l], True)
        hcat = jnp.concatenate([hf, hb], axis=-1)
        cur = jnp.einsum('bth,hd->btd', hcat, wfc[l]) + bfc[l]
    return cur


if __name__ == "__main__":
    key = jax.random.PRNGKey(0)
    k_p, k_x1, k_x0 = jax.random.split(key, 3)

    B, T, D, H, REPEAT = 2, 8, 32, 32, 2
    params = init_cascade_params(k_p, input_size=D, hidden_size=H, repeat=REPEAT)

    # mode 1 (default): sequence feature [B, T, D] -> [B, T, D]
    x1 = jax.random.normal(k_x1, (B, T, D), jnp.float32)
    y1 = jax.block_until_ready(cascade_rnn_forward(x1, params, mode=1))
    assert y1.shape == (B, T, D)
    ref1 = jax.block_until_ready(_reference_cascade(x1, params))
    max_err = float(jnp.max(jnp.abs(y1 - ref1)))
    assert jnp.allclose(y1, ref1, atol=3e-2, rtol=3e-2), f"max abs err {max_err}"

    # mode 0: visual feature [B, C, H, W]; C plays the role of input_size
    C, Hsp, Wsp = D, 4, 4
    x0 = jax.random.normal(k_x0, (B, C, Hsp, Wsp), jnp.float32)
    y0 = jax.block_until_ready(cascade_rnn_forward(x0, params, mode=0))
    assert y0.shape == (B, C, 1, Hsp * Wsp)

    print("KERNEL_OK")
</pallas_src>

<mosaic_0001>
module attributes {stable_mosaic.version = 11 : i64} {
  func.func @_cascade_bilstm_kernel(%arg0: i32, %arg1: memref<1x8x32xf32, #tpu.memory_space<vmem>>, %arg2: memref<2x32x128xf32, #tpu.memory_space<vmem>>, %arg3: memref<2x32x128xf32, #tpu.memory_space<vmem>>, %arg4: memref<2x1x128xf32, #tpu.memory_space<vmem>>, %arg5: memref<2x32x128xf32, #tpu.memory_space<vmem>>, %arg6: memref<2x32x128xf32, #tpu.memory_space<vmem>>, %arg7: memref<2x1x128xf32, #tpu.memory_space<vmem>>, %arg8: memref<2x64x32xf32, #tpu.memory_space<vmem>>, %arg9: memref<2x1x32xf32, #tpu.memory_space<vmem>>, %arg10: memref<1x8x32xf32, #tpu.memory_space<vmem>>, %arg11: memref<8x128xf32, #tpu.memory_space<vmem>>, %arg12: memref<8x128xf32, #tpu.memory_space<vmem>>, %arg13: memref<8x32xf32, #tpu.memory_space<vmem>>, %arg14: memref<8x32xf32, #tpu.memory_space<vmem>>, %arg15: memref<2x1x32xf32, #tpu.memory_space<vmem>>, %arg16: memref<8x32xf32, #tpu.memory_space<vmem>>) attributes {dimension_semantics = [#tpu.dimension_semantics<parallel>], iteration_bounds = array<i64: 2>, scalar_prefetch = 0 : i64, scratch_operands = 6 : i64, tpu.core_type = #tpu.core_type<tc>, window_params = [{transform_indices = @transform_0, window_bounds = array<i64: 1, 8, 32>}, {pipeline_mode = #tpu.pipeline_mode<synchronous>, transform_indices = @transform_1, window_bounds = array<i64: 2, 32, 128>}, {pipeline_mode = #tpu.pipeline_mode<synchronous>, transform_indices = @transform_2, window_bounds = array<i64: 2, 32, 128>}, {pipeline_mode = #tpu.pipeline_mode<synchronous>, transform_indices = @transform_3, window_bounds = array<i64: 2, 1, 128>}, {pipeline_mode = #tpu.pipeline_mode<synchronous>, transform_indices = @transform_4, window_bounds = array<i64: 2, 32, 128>}, {pipeline_mode = #tpu.pipeline_mode<synchronous>, transform_indices = @transform_5, window_bounds = array<i64: 2, 32, 128>}, {pipeline_mode = #tpu.pipeline_mode<synchronous>, transform_indices = @transform_6, window_bounds = array<i64: 2, 1, 128>}, {pipeline_mode = #tpu.pipeline_mode<synchronous>, transform_indices = @transform_7, window_bounds = array<i64: 2, 64, 32>}, {pipeline_mode = #tpu.pipeline_mode<synchronous>, transform_indices = @transform_8, window_bounds = array<i64: 2, 1, 32>}, {transform_indices = @transform_9, window_bounds = array<i64: 1, 8, 32>}]} {
    %c0 = arith.constant 0 : index
    %c0_0 = arith.constant 0 : index
    %c0_1 = arith.constant 0 : index
    %0 = vector.load %arg1[%c0, %c0_0, %c0_1] : memref<1x8x32xf32, #tpu.memory_space<vmem>>, vector<1x8x32xf32>
    %1 = vector.shape_cast %0 : vector<1x8x32xf32> to vector<8x32xf32>
    %c0_2 = arith.constant 0 : index
    %c0_3 = arith.constant 0 : index
    %2 = vector.load %arg16[%c0_2, %c0_3] : memref<8x32xf32, #tpu.memory_space<vmem>>, vector<8x32xf32>
    tpu.vector_store %arg16[%c0_2, %c0_3], %1 {strides = array<i32>} : memref<8x32xf32, #tpu.memory_space<vmem>>, vector<8x32xf32>,
    %c0_4 = arith.constant 0 : index
    %c0_5 = arith.constant 0 : index
    %3 = vector.load %arg16[%c0_4, %c0_5] : memref<8x32xf32, #tpu.memory_space<vmem>>, vector<8x32xf32>
    %c0_6 = arith.constant 0 : index
    %c0_7 = arith.constant 0 : index
    %c0_8 = arith.constant 0 : index
    %4 = vector.load %arg2[%c0_6, %c0_7, %c0_8] : memref<2x32x128xf32, #tpu.memory_space<vmem>>, vector<1x32x128xf32>
    %5 = vector.shape_cast %4 : vector<1x32x128xf32> to vector<32x128xf32>
    %cst = arith.constant dense<0.000000e+00> : vector<8x128xf32>
    %6 = tpu.matmul %3, %5, %cst {dimension_numbers = #tpu.dot_dimension_numbers<[1], [0], [0], [1], [0, 0, 1, 1], [], []>} : vector<8x32xf32>, vector<32x128xf32>, vector<8x128xf32> -> vector<8x128xf32>
    %c0_9 = arith.constant 0 : index
    %c0_10 = arith.constant 0 : index
    %c0_11 = arith.constant 0 : index
    %7 = vector.load %arg4[%c0_9, %c0_10, %c0_11] : memref<2x1x128xf32, #tpu.memory_space<vmem>>, vector<1x1x128xf32>
    %8 = vector.shape_cast %7 : vector<1x1x128xf32> to vector<1x128xf32>
    %9 = vector.broadcast %8 : vector<1x128xf32> to vector<8x128xf32>
    %10 = arith.addf %6, %9 : vector<8x128xf32>
    %c0_12 = arith.constant 0 : index
    %c0_13 = arith.constant 0 : index
    %11 = vector.load %arg11[%c0_12, %c0_13] : memref<8x128xf32, #tpu.memory_space<vmem>>, vector<8x128xf32>
    tpu.vector_store %arg11[%c0_12, %c0_13], %10 {strides = array<i32>} : memref<8x128xf32, #tpu.memory_space<vmem>>, vector<8x128xf32>,
    %c0_14 = arith.constant 0 : index
    %c0_15 = arith.constant 0 : index
    %c0_16 = arith.constant 0 : index
    %12 = vector.load %arg5[%c0_14, %c0_15, %c0_16] : memref<2x32x128xf32, #tpu.memory_space<vmem>>, vector<1x32x128xf32>
    %13 = vector.shape_cast %12 : vector<1x32x128xf32> to vector<32x128xf32>
    %cst_17 = arith.constant dense<0.000000e+00> : vector<8x128xf32>
    %14 = tpu.matmul %3, %13, %cst_17 {dimension_numbers = #tpu.dot_dimension_numbers<[1], [0], [0], [1], [0, 0, 1, 1], [], []>} : vector<8x32xf32>, vector<32x128xf32>, vector<8x128xf32> -> vector<8x128xf32>
    %c0_18 = arith.constant 0 : index
    %c0_19 = arith.constant 0 : index
    %c0_20 = arith.constant 0 : index
    %15 = vector.load %arg7[%c0_18, %c0_19, %c0_20] : memref<2x1x128xf32, #tpu.memory_space<vmem>>, vector<1x1x128xf32>
    %16 = vector.shape_cast %15 : vector<1x1x128xf32> to vector<1x128xf32>
    %17 = vector.broadcast %16 : vector<1x128xf32> to vector<8x128xf32>
    %18 = arith.addf %14, %17 : vector<8x128xf32>
    %c0_21 = arith.constant 0 : index
    %c0_22 = arith.constant 0 : index
    %19 = vector.load %arg12[%c0_21, %c0_22] : memref<8x128xf32, #tpu.memory_space<vmem>>, vector<8x128xf32>
    tpu.vector_store %arg12[%c0_21, %c0_22], %18 {strides = array<i32>} : memref<8x128xf32, #tpu.memory_space<vmem>>, vector<8x128xf32>,
    %cst_23 = arith.constant 0.000000e+00 : f32
    %20 = vector.broadcast %cst_23 : f32 to vector<2x1x32xf32>
    %c0_24 = arith.constant 0 : index
    %c0_25 = arith.constant 0 : index
    %c0_26 = arith.constant 0 : index
    %21 = vector.load %arg15[%c0_24, %c0_25, %c0_26] : memref<2x1x32xf32, #tpu.memory_space<vmem>>, vector<2x1x32xf32>
    tpu.vector_store %arg15[%c0_24, %c0_25, %c0_26], %20 {strides = array<i32>} : memref<2x1x32xf32, #tpu.memory_space<vmem>>, vector<2x1x32xf32>,
    %c0_i32 = arith.constant 0 : i32
    %c8_i32 = arith.constant 8 : i32
    %22 = arith.addi %c0_i32, %c8_i32 : i32
    %c1_i32 = arith.constant 1 : i32
    scf.for %arg17 = %c0_i32 to %22 step %c1_i32  : i32 {
      %c1_i32_104 = arith.constant 1 : i32
      %81 = arith.muli %arg17, %c1_i32_104 : i32
      %c0_i32_105 = arith.constant 0 : i32
      %82 = arith.addi %c0_i32_105, %81 : i32
      %83 = arith.index_cast %82 : i32 to index
      %c0_106 = arith.constant 0 : index
      %84 = vector.load %arg11[%83, %c0_106] : memref<8x128xf32, #tpu.memory_space<vmem>>, vector<1x128xf32>
      %c0_107 = arith.constant 0 : index
      %c0_108 = arith.constant 0 : index
      %c0_109 = arith.constant 0 : index
      %85 = vector.load %arg3[%c0_107, %c0_108, %c0_109] : memref<2x32x128xf32, #tpu.memory_space<vmem>>, vector<1x32x128xf32>
      %86 = vector.shape_cast %85 : vector<1x32x128xf32> to vector<32x128xf32>
      %c0_110 = arith.constant 0 : index
      %c0_111 = arith.constant 0 : index
      %c0_112 = arith.constant 0 : index
      %87 = vector.load %arg15[%c0_110, %c0_111, %c0_112] : memref<2x1x32xf32, #tpu.memory_space<vmem>>, vector<1x1x32xf32>
      %88 = vector.shape_cast %87 : vector<1x1x32xf32> to vector<1x32xf32>
      %cst_113 = arith.constant dense<0.000000e+00> : vector<1x128xf32>
      %89 = tpu.matmul %88, %86, %cst_113 {dimension_numbers = #tpu.dot_dimension_numbers<[1], [0], [0], [1], [0, 0, 1, 1], [], []>} : vector<1x32xf32>, vector<32x128xf32>, vector<1x128xf32> -> vector<1x128xf32>
      %90 = arith.addf %84, %89 : vector<1x128xf32>
      %91 = vector.extract_strided_slice %90 {offsets = [0, 0], sizes = [1, 32], strides = [1, 1]} : vector<1x128xf32> to vector<1x32xf32>
      %92 = arith.negf %91 : vector<1x32xf32>
      %93 = math.exp %92 : vector<1x32xf32>
      %cst_114 = arith.constant 1.000000e+00 : f32
      %94 = vector.broadcast %cst_114 : f32 to vector<1x32xf32>
      %95 = arith.addf %94, %93 : vector<1x32xf32>
      %96 = arith.divf %94, %95 : vector<1x32xf32>
      %97 = vector.extract_strided_slice %90 {offsets = [0, 32], sizes = [1, 32], strides = [1, 1]} : vector<1x128xf32> to vector<1x32xf32>
      %98 = arith.negf %97 : vector<1x32xf32>
      %99 = math.exp %98 : vector<1x32xf32>
      %cst_115 = arith.constant 1.000000e+00 : f32
      %100 = vector.broadcast %cst_115 : f32 to vector<1x32xf32>
      %101 = arith.addf %100, %99 : vector<1x32xf32>
      %102 = arith.divf %100, %101 : vector<1x32xf32>
      %103 = vector.extract_strided_slice %90 {offsets = [0, 64], sizes = [1, 32], strides = [1, 1]} : vector<1x128xf32> to vector<1x32xf32>
      %104 = math.tanh %103 : vector<1x32xf32>
      %105 = vector.extract_strided_slice %90 {offsets = [0, 96], sizes = [1, 32], strides = [1, 1]} : vector<1x128xf32> to vector<1x32xf32>
      %106 = arith.negf %105 : vector<1x32xf32>
      %107 = math.exp %106 : vector<1x32xf32>
      %cst_116 = arith.constant 1.000000e+00 : f32
      %108 = vector.broadcast %cst_116 : f32 to vector<1x32xf32>
      %109 = arith.addf %108, %107 : vector<1x32xf32>
      %110 = arith.divf %108, %109 : vector<1x32xf32>
      %c1_117 = arith.constant 1 : index
      %c0_118 = arith.constant 0 : index
      %c0_119 = arith.constant 0 : index
      %111 = vector.load %arg15[%c1_117, %c0_118, %c0_119] : memref<2x1x32xf32, #tpu.memory_space<vmem>>, vector<1x1x32xf32>
      %112 = vector.shape_cast %111 : vector<1x1x32xf32> to vector<1x32xf32>
      %113 = arith.mulf %102, %112 : vector<1x32xf32>
      %114 = arith.mulf %96, %104 : vector<1x32xf32>
      %115 = arith.addf %113, %114 : vector<1x32xf32>
      %116 = math.tanh %115 : vector<1x32xf32>
      %117 = arith.mulf %110, %116 : vector<1x32xf32>
      %c0_120 = arith.constant 0 : index
      %c0_121 = arith.constant 0 : index
      %c0_122 = arith.constant 0 : index
      %118 = vector.load %arg15[%c0_120, %c0_121, %c0_122] : memref<2x1x32xf32, #tpu.memory_space<vmem>>, vector<1x1x32xf32>
      %119 = vector.shape_cast %118 : vector<1x1x32xf32> to vector<1x32xf32>
      %120 = vector.shape_cast %117 : vector<1x32xf32> to vector<1x1x32xf32>
      tpu.vector_store %arg15[%c0_120, %c0_121, %c0_122], %120 {strides = array<i32>} : memref<2x1x32xf32, #tpu.memory_space<vmem>>, vector<1x1x32xf32>,
      %c1_123 = arith.constant 1 : index
      %c0_124 = arith.constant 0 : index
      %c0_125 = arith.constant 0 : index
      %121 = vector.load %arg15[%c1_123, %c0_124, %c0_125] : memref<2x1x32xf32, #tpu.memory_space<vmem>>, vector<1x1x32xf32>
      %122 = vector.shape_cast %121 : vector<1x1x32xf32> to vector<1x32xf32>
      %123 = vector.shape_cast %115 : vector<1x32xf32> to vector<1x1x32xf32>
      tpu.vector_store %arg15[%c1_123, %c0_124, %c0_125], %123 {strides = array<i32>} : memref<2x1x32xf32, #tpu.memory_space<vmem>>, vector<1x1x32xf32>,
      %124 = arith.index_cast %82 : i32 to index
      %c0_126 = arith.constant 0 : index
      %125 = vector.load %arg13[%124, %c0_126] : memref<8x32xf32, #tpu.memory_space<vmem>>, vector<1x32xf32>
      tpu.vector_store %arg13[%124, %c0_126], %117 {strides = array<i32>} : memref<8x32xf32, #tpu.memory_space<vmem>>, vector<1x32xf32>,
    }
    %c8_i32_27 = arith.constant 8 : i32
    %cst_28 = arith.constant 0.000000e+00 : f32
    %23 = vector.broadcast %cst_28 : f32 to vector<2x1x32xf32>
    %c0_29 = arith.constant 0 : index
    %c0_30 = arith.constant 0 : index
    %c0_31 = arith.constant 0 : index
    %24 = vector.load %arg15[%c0_29, %c0_30, %c0_31] : memref<2x1x32xf32, #tpu.memory_space<vmem>>, vector<2x1x32xf32>
    tpu.vector_store %arg15[%c0_29, %c0_30, %c0_31], %23 {strides = array<i32>} : memref<2x1x32xf32, #tpu.memory_space<vmem>>, vector<2x1x32xf32>,
    %c0_i32_32 = arith.constant 0 : i32
    %c8_i32_33 = arith.constant 8 : i32
    %25 = arith.addi %c0_i32_32, %c8_i32_33 : i32
    %c1_i32_34 = arith.constant 1 : i32
    scf.for %arg17 = %c0_i32_32 to %25 step %c1_i32_34  : i32 {
      %c1_i32_104 = arith.constant 1 : i32
      %81 = arith.muli %arg17, %c1_i32_104 : i32
      %c0_i32_105 = arith.constant 0 : i32
      %82 = arith.addi %c0_i32_105, %81 : i32
      %c7_i32 = arith.constant 7 : i32
      %83 = arith.subi %c7_i32, %82 : i32
      %84 = arith.index_cast %83 : i32 to index
      %c0_106 = arith.constant 0 : index
      %85 = vector.load %arg12[%84, %c0_106] : memref<8x128xf32, #tpu.memory_space<vmem>>, vector<1x128xf32>
      %c0_107 = arith.constant 0 : index
      %c0_108 = arith.constant 0 : index
      %c0_109 = arith.constant 0 : index
      %86 = vector.load %arg6[%c0_107, %c0_108, %c0_109] : memref<2x32x128xf32, #tpu.memory_space<vmem>>, vector<1x32x128xf32>
      %87 = vector.shape_cast %86 : vector<1x32x128xf32> to vector<32x128xf32>
      %c0_110 = arith.constant 0 : index
      %c0_111 = arith.constant 0 : index
      %c0_112 = arith.constant 0 : index
      %88 = vector.load %arg15[%c0_110, %c0_111, %c0_112] : memref<2x1x32xf32, #tpu.memory_space<vmem>>, vector<1x1x32xf32>
      %89 = vector.shape_cast %88 : vector<1x1x32xf32> to vector<1x32xf32>
      %cst_113 = arith.constant dense<0.000000e+00> : vector<1x128xf32>
      %90 = tpu.matmul %89, %87, %cst_113 {dimension_numbers = #tpu.dot_dimension_numbers<[1], [0], [0], [1], [0, 0, 1, 1], [], []>} : vector<1x32xf32>, vector<32x128xf32>, vector<1x128xf32> -> vector<1x128xf32>
      %91 = arith.addf %85, %90 : vector<1x128xf32>
      %92 = vector.extract_strided_slice %91 {offsets = [0, 0], sizes = [1, 32], strides = [1, 1]} : vector<1x128xf32> to vector<1x32xf32>
      %93 = arith.negf %92 : vector<1x32xf32>
      %94 = math.exp %93 : vector<1x32xf32>
      %cst_114 = arith.constant 1.000000e+00 : f32
      %95 = vector.broadcast %cst_114 : f32 to vector<1x32xf32>
      %96 = arith.addf %95, %94 : vector<1x32xf32>
      %97 = arith.divf %95, %96 : vector<1x32xf32>
      %98 = vector.extract_strided_slice %91 {offsets = [0, 32], sizes = [1, 32], strides = [1, 1]} : vector<1x128xf32> to vector<1x32xf32>
      %99 = arith.negf %98 : vector<1x32xf32>
      %100 = math.exp %99 : vector<1x32xf32>
      %cst_115 = arith.constant 1.000000e+00 : f32
      %101 = vector.broadcast %cst_115 : f32 to vector<1x32xf32>
      %102 = arith.addf %101, %100 : vector<1x32xf32>
      %103 = arith.divf %101, %102 : vector<1x32xf32>
      %104 = vector.extract_strided_slice %91 {offsets = [0, 64], sizes = [1, 32], strides = [1, 1]} : vector<1x128xf32> to vector<1x32xf32>
      %105 = math.tanh %104 : vector<1x32xf32>
      %106 = vector.extract_strided_slice %91 {offsets = [0, 96], sizes = [1, 32], strides = [1, 1]} : vector<1x128xf32> to vector<1x32xf32>
      %107 = arith.negf %106 : vector<1x32xf32>
      %108 = math.exp %107 : vector<1x32xf32>
      %cst_116 = arith.constant 1.000000e+00 : f32
      %109 = vector.broadcast %cst_116 : f32 to vector<1x32xf32>
      %110 = arith.addf %109, %108 : vector<1x32xf32>
      %111 = arith.divf %109, %110 : vector<1x32xf32>
      %c1_117 = arith.constant 1 : index
      %c0_118 = arith.constant 0 : index
      %c0_119 = arith.constant 0 : index
      %112 = vector.load %arg15[%c1_117, %c0_118, %c0_119] : memref<2x1x32xf32, #tpu.memory_space<vmem>>, vector<1x1x32xf32>
      %113 = vector.shape_cast %112 : vector<1x1x32xf32> to vector<1x32xf32>
      %114 = arith.mulf %103, %113 : vector<1x32xf32>
      %115 = arith.mulf %97, %105 : vector<1x32xf32>
      %116 = arith.addf %114, %115 : vector<1x32xf32>
      %117 = math.tanh %116 : vector<1x32xf32>
      %118 = arith.mulf %111, %117 : vector<1x32xf32>
      %c0_120 = arith.constant 0 : index
      %c0_121 = arith.constant 0 : index
      %c0_122 = arith.constant 0 : index
      %119 = vector.load %arg15[%c0_120, %c0_121, %c0_122] : memref<2x1x32xf32, #tpu.memory_space<vmem>>, vector<1x1x32xf32>
      %120 = vector.shape_cast %119 : vector<1x1x32xf32> to vector<1x32xf32>
      %121 = vector.shape_cast %118 : vector<1x32xf32> to vector<1x1x32xf32>
      tpu.vector_store %arg15[%c0_120, %c0_121, %c0_122], %121 {strides = array<i32>} : memref<2x1x32xf32, #tpu.memory_space<vmem>>, vector<1x1x32xf32>,
      %c1_123 = arith.constant 1 : index
      %c0_124 = arith.constant 0 : index
      %c0_125 = arith.constant 0 : index
      %122 = vector.load %arg15[%c1_123, %c0_124, %c0_125] : memref<2x1x32xf32, #tpu.memory_space<vmem>>, vector<1x1x32xf32>
      %123 = vector.shape_cast %122 : vector<1x1x32xf32> to vector<1x32xf32>
      %124 = vector.shape_cast %116 : vector<1x32xf32> to vector<1x1x32xf32>
      tpu.vector_store %arg15[%c1_123, %c0_124, %c0_125], %124 {strides = array<i32>} : memref<2x1x32xf32, #tpu.memory_space<vmem>>, vector<1x1x32xf32>,
      %125 = arith.index_cast %83 : i32 to index
      %c0_126 = arith.constant 0 : index
      %126 = vector.load %arg14[%125, %c0_126] : memref<8x32xf32, #tpu.memory_space<vmem>>, vector<1x32xf32>
      tpu.vector_store %arg14[%125, %c0_126], %118 {strides = array<i32>} : memref<8x32xf32, #tpu.memory_space<vmem>>, vector<1x32xf32>,
    }
    %c8_i32_35 = arith.constant 8 : i32
    %c0_36 = arith.constant 0 : index
    %c0_37 = arith.constant 0 : index
    %c0_38 = arith.constant 0 : index
    %26 = vector.load %arg8[%c0_36, %c0_37, %c0_38] : memref<2x64x32xf32, #tpu.memory_space<vmem>>, vector<1x64x32xf32>
    %27 = vector.shape_cast %26 : vector<1x64x32xf32> to vector<64x32xf32>
    %c0_39 = arith.constant 0 : index
    %c0_40 = arith.constant 0 : index
    %28 = vector.load %arg13[%c0_39, %c0_40] : memref<8x32xf32, #tpu.memory_space<vmem>>, vector<8x32xf32>
    %29 = vector.extract_strided_slice %27 {offsets = [0, 0], sizes = [32, 32], strides = [1, 1]} : vector<64x32xf32> to vector<32x32xf32>
    %cst_41 = arith.constant dense<0.000000e+00> : vector<8x32xf32>
    %30 = tpu.matmul %28, %29, %cst_41 {dimension_numbers = #tpu.dot_dimension_numbers<[1], [0], [0], [1], [0, 0, 1, 1], [], []>} : vector<8x32xf32>, vector<32x32xf32>, vector<8x32xf32> -> vector<8x32xf32>
    %c0_42 = arith.constant 0 : index
    %c0_43 = arith.constant 0 : index
    %31 = vector.load %arg14[%c0_42, %c0_43] : memref<8x32xf32, #tpu.memory_space<vmem>>, vector<8x32xf32>
    %32 = vector.extract_strided_slice %27 {offsets = [32, 0], sizes = [32, 32], strides = [1, 1]} : vector<64x32xf32> to vector<32x32xf32>
    %cst_44 = arith.constant dense<0.000000e+00> : vector<8x32xf32>
    %33 = tpu.matmul %31, %32, %cst_44 {dimension_numbers = #tpu.dot_dimension_numbers<[1], [0], [0], [1], [0, 0, 1, 1], [], []>} : vector<8x32xf32>, vector<32x32xf32>, vector<8x32xf32> -> vector<8x32xf32>
    %34 = arith.addf %30, %33 : vector<8x32xf32>
    %c0_45 = arith.constant 0 : index
    %c0_46 = arith.constant 0 : index
    %c0_47 = arith.constant 0 : index
    %35 = vector.load %arg9[%c0_45, %c0_46, %c0_47] : memref<2x1x32xf32, #tpu.memory_space<vmem>>, vector<1x1x32xf32>
    %36 = vector.shape_cast %35 : vector<1x1x32xf32> to vector<1x32xf32>
    %37 = vector.broadcast %36 : vector<1x32xf32> to vector<8x32xf32>
    %38 = arith.addf %34, %37 : vector<8x32xf32>
    %c0_48 = arith.constant 0 : index
    %c0_49 = arith.constant 0 : index
    %39 = vector.load %arg16[%c0_48, %c0_49] : memref<8x32xf32, #tpu.memory_space<vmem>>, vector<8x32xf32>
    tpu.vector_store %arg16[%c0_48, %c0_49], %38 {strides = array<i32>} : memref<8x32xf32, #tpu.memory_space<vmem>>, vector<8x32xf32>,
    %c0_50 = arith.constant 0 : index
    %c0_51 = arith.constant 0 : index
    %40 = vector.load %arg16[%c0_50, %c0_51] : memref<8x32xf32, #tpu.memory_space<vmem>>, vector<8x32xf32>
    %c1 = arith.constant 1 : index
    %c0_52 = arith.constant 0 : index
    %c0_53 = arith.constant 0 : index
    %41 = vector.load %arg2[%c1, %c0_52, %c0_53] : memref<2x32x128xf32, #tpu.memory_space<vmem>>, vector<1x32x128xf32>
    %42 = vector.shape_cast %41 : vector<1x32x128xf32> to vector<32x128xf32>
    %cst_54 = arith.constant dense<0.000000e+00> : vector<8x128xf32>
    %43 = tpu.matmul %40, %42, %cst_54 {dimension_numbers = #tpu.dot_dimension_numbers<[1], [0], [0], [1], [0, 0, 1, 1], [], []>} : vector<8x32xf32>, vector<32x128xf32>, vector<8x128xf32> -> vector<8x128xf32>
    %c1_55 = arith.constant 1 : index
    %c0_56 = arith.constant 0 : index
    %c0_57 = arith.constant 0 : index
    %44 = vector.load %arg4[%c1_55, %c0_56, %c0_57] : memref<2x1x128xf32, #tpu.memory_space<vmem>>, vector<1x1x128xf32>
    %45 = vector.shape_cast %44 : vector<1x1x128xf32> to vector<1x128xf32>
    %46 = vector.broadcast %45 : vector<1x128xf32> to vector<8x128xf32>
    %47 = arith.addf %43, %46 : vector<8x128xf32>
    %c0_58 = arith.constant 0 : index
    %c0_59 = arith.constant 0 : index
    %48 = vector.load %arg11[%c0_58, %c0_59] : memref<8x128xf32, #tpu.memory_space<vmem>>, vector<8x128xf32>
    tpu.vector_store %arg11[%c0_58, %c0_59], %47 {strides = array<i32>} : memref<8x128xf32, #tpu.memory_space<vmem>>, vector<8x128xf32>,
    %c1_60 = arith.constant 1 : index
    %c0_61 = arith.constant 0 : index
    %c0_62 = arith.constant 0 : index
    %49 = vector.load %arg5[%c1_60, %c0_61, %c0_62] : memref<2x32x128xf32, #tpu.memory_space<vmem>>, vector<1x32x128xf32>
    %50 = vector.shape_cast %49 : vector<1x32x128xf32> to vector<32x128xf32>
    %cst_63 = arith.constant dense<0.000000e+00> : vector<8x128xf32>
    %51 = tpu.matmul %40, %50, %cst_63 {dimension_numbers = #tpu.dot_dimension_numbers<[1], [0], [0], [1], [0, 0, 1, 1], [], []>} : vector<8x32xf32>, vector<32x128xf32>, vector<8x128xf32> -> vector<8x128xf32>
    %c1_64 = arith.constant 1 : index
    %c0_65 = arith.constant 0 : index
    %c0_66 = arith.constant 0 : index
    %52 = vector.load %arg7[%c1_64, %c0_65, %c0_66] : memref<2x1x128xf32, #tpu.memory_space<vmem>>, vector<1x1x128xf32>
    %53 = vector.shape_cast %52 : vector<1x1x128xf32> to vector<1x128xf32>
    %54 = vector.broadcast %53 : vector<1x128xf32> to vector<8x128xf32>
    %55 = arith.addf %51, %54 : vector<8x128xf32>
    %c0_67 = arith.constant 0 : index
    %c0_68 = arith.constant 0 : index
    %56 = vector.load %arg12[%c0_67, %c0_68] : memref<8x128xf32, #tpu.memory_space<vmem>>, vector<8x128xf32>
    tpu.vector_store %arg12[%c0_67, %c0_68], %55 {strides = array<i32>} : memref<8x128xf32, #tpu.memory_space<vmem>>, vector<8x128xf32>,
    %cst_69 = arith.constant 0.000000e+00 : f32
    %57 = vector.broadcast %cst_69 : f32 to vector<2x1x32xf32>
    %c0_70 = arith.constant 0 : index
    %c0_71 = arith.constant 0 : index
    %c0_72 = arith.constant 0 : index
    %58 = vector.load %arg15[%c0_70, %c0_71, %c0_72] : memref<2x1x32xf32, #tpu.memory_space<vmem>>, vector<2x1x32xf32>
    tpu.vector_store %arg15[%c0_70, %c0_71, %c0_72], %57 {strides = array<i32>} : memref<2x1x32xf32, #tpu.memory_space<vmem>>, vector<2x1x32xf32>,
    %c0_i32_73 = arith.constant 0 : i32
    %c8_i32_74 = arith.constant 8 : i32
    %59 = arith.addi %c0_i32_73, %c8_i32_74 : i32
    %c1_i32_75 = arith.constant 1 : i32
    scf.for %arg17 = %c0_i32_73 to %59 step %c1_i32_75  : i32 {
      %c1_i32_104 = arith.constant 1 : i32
      %81 = arith.muli %arg17, %c1_i32_104 : i32
      %c0_i32_105 = arith.constant 0 : i32
      %82 = arith.addi %c0_i32_105, %81 : i32
      %83 = arith.index_cast %82 : i32 to index
      %c0_106 = arith.constant 0 : index
      %84 = vector.load %arg11[%83, %c0_106] : memref<8x128xf32, #tpu.memory_space<vmem>>, vector<1x128xf32>
      %c1_107 = arith.constant 1 : index
      %c0_108 = arith.constant 0 : index
      %c0_109 = arith.constant 0 : index
      %85 = vector.load %arg3[%c1_107, %c0_108, %c0_109] : memref<2x32x128xf32, #tpu.memory_space<vmem>>, vector<1x32x128xf32>
      %86 = vector.shape_cast %85 : vector<1x32x128xf32> to vector<32x128xf32>
      %c0_110 = arith.constant 0 : index
      %c0_111 = arith.constant 0 : index
      %c0_112 = arith.constant 0 : index
      %87 = vector.load %arg15[%c0_110, %c0_111, %c0_112] : memref<2x1x32xf32, #tpu.memory_space<vmem>>, vector<1x1x32xf32>
      %88 = vector.shape_cast %87 : vector<1x1x32xf32> to vector<1x32xf32>
      %cst_113 = arith.constant dense<0.000000e+00> : vector<1x128xf32>
      %89 = tpu.matmul %88, %86, %cst_113 {dimension_numbers = #tpu.dot_dimension_numbers<[1], [0], [0], [1], [0, 0, 1, 1], [], []>} : vector<1x32xf32>, vector<32x128xf32>, vector<1x128xf32> -> vector<1x128xf32>
      %90 = arith.addf %84, %89 : vector<1x128xf32>
      %91 = vector.extract_strided_slice %90 {offsets = [0, 0], sizes = [1, 32], strides = [1, 1]} : vector<1x128xf32> to vector<1x32xf32>
      %92 = arith.negf %91 : vector<1x32xf32>
      %93 = math.exp %92 : vector<1x32xf32>
      %cst_114 = arith.constant 1.000000e+00 : f32
      %94 = vector.broadcast %cst_114 : f32 to vector<1x32xf32>
      %95 = arith.addf %94, %93 : vector<1x32xf32>
      %96 = arith.divf %94, %95 : vector<1x32xf32>
      %97 = vector.extract_strided_slice %90 {offsets = [0, 32], sizes = [1, 32], strides = [1, 1]} : vector<1x128xf32> to vector<1x32xf32>
      %98 = arith.negf %97 : vector<1x32xf32>
      %99 = math.exp %98 : vector<1x32xf32>
      %cst_115 = arith.constant 1.000000e+00 : f32
      %100 = vector.broadcast %cst_115 : f32 to vector<1x32xf32>
      %101 = arith.addf %100, %99 : vector<1x32xf32>
      %102 = arith.divf %100, %101 : vector<1x32xf32>
      %103 = vector.extract_strided_slice %90 {offsets = [0, 64], sizes = [1, 32], strides = [1, 1]} : vector<1x128xf32> to vector<1x32xf32>
      %104 = math.tanh %103 : vector<1x32xf32>
      %105 = vector.extract_strided_slice %90 {offsets = [0, 96], sizes = [1, 32], strides = [1, 1]} : vector<1x128xf32> to vector<1x32xf32>
      %106 = arith.negf %105 : vector<1x32xf32>
      %107 = math.exp %106 : vector<1x32xf32>
      %cst_116 = arith.constant 1.000000e+00 : f32
      %108 = vector.broadcast %cst_116 : f32 to vector<1x32xf32>
      %109 = arith.addf %108, %107 : vector<1x32xf32>
      %110 = arith.divf %108, %109 : vector<1x32xf32>
      %c1_117 = arith.constant 1 : index
      %c0_118 = arith.constant 0 : index
      %c0_119 = arith.constant 0 : index
      %111 = vector.load %arg15[%c1_117, %c0_118, %c0_119] : memref<2x1x32xf32, #tpu.memory_space<vmem>>, vector<1x1x32xf32>
      %112 = vector.shape_cast %111 : vector<1x1x32xf32> to vector<1x32xf32>
      %113 = arith.mulf %102, %112 : vector<1x32xf32>
      %114 = arith.mulf %96, %104 : vector<1x32xf32>
      %115 = arith.addf %113, %114 : vector<1x32xf32>
      %116 = math.tanh %115 : vector<1x32xf32>
      %117 = arith.mulf %110, %116 : vector<1x32xf32>
      %c0_120 = arith.constant 0 : index
      %c0_121 = arith.constant 0 : index
      %c0_122 = arith.constant 0 : index
      %118 = vector.load %arg15[%c0_120, %c0_121, %c0_122] : memref<2x1x32xf32, #tpu.memory_space<vmem>>, vector<1x1x32xf32>
      %119 = vector.shape_cast %118 : vector<1x1x32xf32> to vector<1x32xf32>
      %120 = vector.shape_cast %117 : vector<1x32xf32> to vector<1x1x32xf32>
      tpu.vector_store %arg15[%c0_120, %c0_121, %c0_122], %120 {strides = array<i32>} : memref<2x1x32xf32, #tpu.memory_space<vmem>>, vector<1x1x32xf32>,
      %c1_123 = arith.constant 1 : index
      %c0_124 = arith.constant 0 : index
      %c0_125 = arith.constant 0 : index
      %121 = vector.load %arg15[%c1_123, %c0_124, %c0_125] : memref<2x1x32xf32, #tpu.memory_space<vmem>>, vector<1x1x32xf32>
      %122 = vector.shape_cast %121 : vector<1x1x32xf32> to vector<1x32xf32>
      %123 = vector.shape_cast %115 : vector<1x32xf32> to vector<1x1x32xf32>
      tpu.vector_store %arg15[%c1_123, %c0_124, %c0_125], %123 {strides = array<i32>} : memref<2x1x32xf32, #tpu.memory_space<vmem>>, vector<1x1x32xf32>,
      %124 = arith.index_cast %82 : i32 to index
      %c0_126 = arith.constant 0 : index
      %125 = vector.load %arg13[%124, %c0_126] : memref<8x32xf32, #tpu.memory_space<vmem>>, vector<1x32xf32>
      tpu.vector_store %arg13[%124, %c0_126], %117 {strides = array<i32>} : memref<8x32xf32, #tpu.memory_space<vmem>>, vector<1x32xf32>,
    }
    %c8_i32_76 = arith.constant 8 : i32
    %cst_77 = arith.constant 0.000000e+00 : f32
    %60 = vector.broadcast %cst_77 : f32 to vector<2x1x32xf32>
    %c0_78 = arith.constant 0 : index
    %c0_79 = arith.constant 0 : index
    %c0_80 = arith.constant 0 : index
    %61 = vector.load %arg15[%c0_78, %c0_79, %c0_80] : memref<2x1x32xf32, #tpu.memory_space<vmem>>, vector<2x1x32xf32>
    tpu.vector_store %arg15[%c0_78, %c0_79, %c0_80], %60 {strides = array<i32>} : memref<2x1x32xf32, #tpu.memory_space<vmem>>, vector<2x1x32xf32>,
    %c0_i32_81 = arith.constant 0 : i32
    %c8_i32_82 = arith.constant 8 : i32
    %62 = arith.addi %c0_i32_81, %c8_i32_82 : i32
    %c1_i32_83 = arith.constant 1 : i32
    scf.for %arg17 = %c0_i32_81 to %62 step %c1_i32_83  : i32 {
      %c1_i32_104 = arith.constant 1 : i32
      %81 = arith.muli %arg17, %c1_i32_104 : i32
      %c0_i32_105 = arith.constant 0 : i32
      %82 = arith.addi %c0_i32_105, %81 : i32
      %c7_i32 = arith.constant 7 : i32
      %83 = arith.subi %c7_i32, %82 : i32
      %84 = arith.index_cast %83 : i32 to index
      %c0_106 = arith.constant 0 : index
      %85 = vector.load %arg12[%84, %c0_106] : memref<8x128xf32, #tpu.memory_space<vmem>>, vector<1x128xf32>
      %c1_107 = arith.constant 1 : index
      %c0_108 = arith.constant 0 : index
      %c0_109 = arith.constant 0 : index
      %86 = vector.load %arg6[%c1_107, %c0_108, %c0_109] : memref<2x32x128xf32, #tpu.memory_space<vmem>>, vector<1x32x128xf32>
      %87 = vector.shape_cast %86 : vector<1x32x128xf32> to vector<32x128xf32>
      %c0_110 = arith.constant 0 : index
      %c0_111 = arith.constant 0 : index
      %c0_112 = arith.constant 0 : index
      %88 = vector.load %arg15[%c0_110, %c0_111, %c0_112] : memref<2x1x32xf32, #tpu.memory_space<vmem>>, vector<1x1x32xf32>
      %89 = vector.shape_cast %88 : vector<1x1x32xf32> to vector<1x32xf32>
      %cst_113 = arith.constant dense<0.000000e+00> : vector<1x128xf32>
      %90 = tpu.matmul %89, %87, %cst_113 {dimension_numbers = #tpu.dot_dimension_numbers<[1], [0], [0], [1], [0, 0, 1, 1], [], []>} : vector<1x32xf32>, vector<32x128xf32>, vector<1x128xf32> -> vector<1x128xf32>
      %91 = arith.addf %85, %90 : vector<1x128xf32>
      %92 = vector.extract_strided_slice %91 {offsets = [0, 0], sizes = [1, 32], strides = [1, 1]} : vector<1x128xf32> to vector<1x32xf32>
      %93 = arith.negf %92 : vector<1x32xf32>
      %94 = math.exp %93 : vector<1x32xf32>
      %cst_114 = arith.constant 1.000000e+00 : f32
      %95 = vector.broadcast %cst_114 : f32 to vector<1x32xf32>
      %96 = arith.addf %95, %94 : vector<1x32xf32>
      %97 = arith.divf %95, %96 : vector<1x32xf32>
      %98 = vector.extract_strided_slice %91 {offsets = [0, 32], sizes = [1, 32], strides = [1, 1]} : vector<1x128xf32> to vector<1x32xf32>
      %99 = arith.negf %98 : vector<1x32xf32>
      %100 = math.exp %99 : vector<1x32xf32>
      %cst_115 = arith.constant 1.000000e+00 : f32
      %101 = vector.broadcast %cst_115 : f32 to vector<1x32xf32>
      %102 = arith.addf %101, %100 : vector<1x32xf32>
      %103 = arith.divf %101, %102 : vector<1x32xf32>
      %104 = vector.extract_strided_slice %91 {offsets = [0, 64], sizes = [1, 32], strides = [1, 1]} : vector<1x128xf32> to vector<1x32xf32>
      %105 = math.tanh %104 : vector<1x32xf32>
      %106 = vector.extract_strided_slice %91 {offsets = [0, 96], sizes = [1, 32], strides = [1, 1]} : vector<1x128xf32> to vector<1x32xf32>
      %107 = arith.negf %106 : vector<1x32xf32>
      %108 = math.exp %107 : vector<1x32xf32>
      %cst_116 = arith.constant 1.000000e+00 : f32
      %109 = vector.broadcast %cst_116 : f32 to vector<1x32xf32>
      %110 = arith.addf %109, %108 : vector<1x32xf32>
      %111 = arith.divf %109, %110 : vector<1x32xf32>
      %c1_117 = arith.constant 1 : index
      %c0_118 = arith.constant 0 : index
      %c0_119 = arith.constant 0 : index
      %112 = vector.load %arg15[%c1_117, %c0_118, %c0_119] : memref<2x1x32xf32, #tpu.memory_space<vmem>>, vector<1x1x32xf32>
      %113 = vector.shape_cast %112 : vector<1x1x32xf32> to vector<1x32xf32>
      %114 = arith.mulf %103, %113 : vector<1x32xf32>
      %115 = arith.mulf %97, %105 : vector<1x32xf32>
      %116 = arith.addf %114, %115 : vector<1x32xf32>
      %117 = math.tanh %116 : vector<1x32xf32>
      %118 = arith.mulf %111, %117 : vector<1x32xf32>
      %c0_120 = arith.constant 0 : index
      %c0_121 = arith.constant 0 : index
      %c0_122 = arith.constant 0 : index
      %119 = vector.load %arg15[%c0_120, %c0_121, %c0_122] : memref<2x1x32xf32, #tpu.memory_space<vmem>>, vector<1x1x32xf32>
      %120 = vector.shape_cast %119 : vector<1x1x32xf32> to vector<1x32xf32>
      %121 = vector.shape_cast %118 : vector<1x32xf32> to vector<1x1x32xf32>
      tpu.vector_store %arg15[%c0_120, %c0_121, %c0_122], %121 {strides = array<i32>} : memref<2x1x32xf32, #tpu.memory_space<vmem>>, vector<1x1x32xf32>,
      %c1_123 = arith.constant 1 : index
      %c0_124 = arith.constant 0 : index
      %c0_125 = arith.constant 0 : index
      %122 = vector.load %arg15[%c1_123, %c0_124, %c0_125] : memref<2x1x32xf32, #tpu.memory_space<vmem>>, vector<1x1x32xf32>
      %123 = vector.shape_cast %122 : vector<1x1x32xf32> to vector<1x32xf32>
      %124 = vector.shape_cast %116 : vector<1x32xf32> to vector<1x1x32xf32>
      tpu.vector_store %arg15[%c1_123, %c0_124, %c0_125], %124 {strides = array<i32>} : memref<2x1x32xf32, #tpu.memory_space<vmem>>, vector<1x1x32xf32>,
      %125 = arith.index_cast %83 : i32 to index
      %c0_126 = arith.constant 0 : index
      %126 = vector.load %arg14[%125, %c0_126] : memref<8x32xf32, #tpu.memory_space<vmem>>, vector<1x32xf32>
      tpu.vector_store %arg14[%125, %c0_126], %118 {strides = array<i32>} : memref<8x32xf32, #tpu.memory_space<vmem>>, vector<1x32xf32>,
    }
    %c8_i32_84 = arith.constant 8 : i32
    %c1_85 = arith.constant 1 : index
    %c0_86 = arith.constant 0 : index
    %c0_87 = arith.constant 0 : index
    %63 = vector.load %arg8[%c1_85, %c0_86, %c0_87] : memref<2x64x32xf32, #tpu.memory_space<vmem>>, vector<1x64x32xf32>
    %64 = vector.shape_cast %63 : vector<1x64x32xf32> to vector<64x32xf32>
    %c0_88 = arith.constant 0 : index
    %c0_89 = arith.constant 0 : index
    %65 = vector.load %arg13[%c0_88, %c0_89] : memref<8x32xf32, #tpu.memory_space<vmem>>, vector<8x32xf32>
    %66 = vector.extract_strided_slice %64 {offsets = [0, 0], sizes = [32, 32], strides = [1, 1]} : vector<64x32xf32> to vector<32x32xf32>
    %cst_90 = arith.constant dense<0.000000e+00> : vector<8x32xf32>
    %67 = tpu.matmul %65, %66, %cst_90 {dimension_numbers = #tpu.dot_dimension_numbers<[1], [0], [0], [1], [0, 0, 1, 1], [], []>} : vector<8x32xf32>, vector<32x32xf32>, vector<8x32xf32> -> vector<8x32xf32>
    %c0_91 = arith.constant 0 : index
    %c0_92 = arith.constant 0 : index
    %68 = vector.load %arg14[%c0_91, %c0_92] : memref<8x32xf32, #tpu.memory_space<vmem>>, vector<8x32xf32>
    %69 = vector.extract_strided_slice %64 {offsets = [32, 0], sizes = [32, 32], strides = [1, 1]} : vector<64x32xf32> to vector<32x32xf32>
    %cst_93 = arith.constant dense<0.000000e+00> : vector<8x32xf32>
    %70 = tpu.matmul %68, %69, %cst_93 {dimension_numbers = #tpu.dot_dimension_numbers<[1], [0], [0], [1], [0, 0, 1, 1], [], []>} : vector<8x32xf32>, vector<32x32xf32>, vector<8x32xf32> -> vector<8x32xf32>
    %71 = arith.addf %67, %70 : vector<8x32xf32>
    %c1_94 = arith.constant 1 : index
    %c0_95 = arith.constant 0 : index
    %c0_96 = arith.constant 0 : index
    %72 = vector.load %arg9[%c1_94, %c0_95, %c0_96] : memref<2x1x32xf32, #tpu.memory_space<vmem>>, vector<1x1x32xf32>
    %73 = vector.shape_cast %72 : vector<1x1x32xf32> to vector<1x32xf32>
    %74 = vector.broadcast %73 : vector<1x32xf32> to vector<8x32xf32>
    %75 = arith.addf %71, %74 : vector<8x32xf32>
    %c0_97 = arith.constant 0 : index
    %c0_98 = arith.constant 0 : index
    %76 = vector.load %arg16[%c0_97, %c0_98] : memref<8x32xf32, #tpu.memory_space<vmem>>, vector<8x32xf32>
    tpu.vector_store %arg16[%c0_97, %c0_98], %75 {strides = array<i32>} : memref<8x32xf32, #tpu.memory_space<vmem>>, vector<8x32xf32>,
    %c0_99 = arith.constant 0 : index
    %c0_100 = arith.constant 0 : index
    %77 = vector.load %arg16[%c0_99, %c0_100] : memref<8x32xf32, #tpu.memory_space<vmem>>, vector<8x32xf32>
    %c0_101 = arith.constant 0 : index
    %c0_102 = arith.constant 0 : index
    %c0_103 = arith.constant 0 : index
    %78 = vector.load %arg10[%c0_101, %c0_102, %c0_103] : memref<1x8x32xf32, #tpu.memory_space<vmem>>, vector<1x8x32xf32>
    %79 = vector.shape_cast %78 : vector<1x8x32xf32> to vector<8x32xf32>
    %80 = vector.shape_cast %77 : vector<8x32xf32> to vector<1x8x32xf32>
    tpu.vector_store %arg10[%c0_101, %c0_102, %c0_103], %80 {strides = array<i32>} : memref<1x8x32xf32, #tpu.memory_space<vmem>>, vector<1x8x32xf32>,
    return
  }
  func.func @transform_0(%arg0: i32) -> (i32, i32, i32) {
    %c0_i32 = arith.constant 0 : i32
    %c0_i32_0 = arith.constant 0 : i32
    %c0_i32_1 = arith.constant 0 : i32
    return %arg0, %c0_i32, %c0_i32_0 : i32, i32, i32
  }
  func.func @transform_1(%arg0: i32) -> (i32, i32, i32) {
    %c0_i32 = arith.constant 0 : i32
    %c0_i32_0 = arith.constant 0 : i32
    %c0_i32_1 = arith.constant 0 : i32
    %c0_i32_2 = arith.constant 0 : i32
    return %c0_i32, %c0_i32_0, %c0_i32_1 : i32, i32, i32
  }
  func.func @transform_2(%arg0: i32) -> (i32, i32, i32) {
    %c0_i32 = arith.constant 0 : i32
    %c0_i32_0 = arith.constant 0 : i32
    %c0_i32_1 = arith.constant 0 : i32
    %c0_i32_2 = arith.constant 0 : i32
    return %c0_i32, %c0_i32_0, %c0_i32_1 : i32, i32, i32
  }
  func.func @transform_3(%arg0: i32) -> (i32, i32, i32) {
    %c0_i32 = arith.constant 0 : i32
    %c0_i32_0 = arith.constant 0 : i32
    %c0_i32_1 = arith.constant 0 : i32
    %c0_i32_2 = arith.constant 0 : i32
    return %c0_i32, %c0_i32_0, %c0_i32_1 : i32, i32, i32
  }
  func.func @transform_4(%arg0: i32) -> (i32, i32, i32) {
    %c0_i32 = arith.constant 0 : i32
    %c0_i32_0 = arith.constant 0 : i32
    %c0_i32_1 = arith.constant 0 : i32
    %c0_i32_2 = arith.constant 0 : i32
    return %c0_i32, %c0_i32_0, %c0_i32_1 : i32, i32, i32
  }
  func.func @transform_5(%arg0: i32) -> (i32, i32, i32) {
    %c0_i32 = arith.constant 0 : i32
    %c0_i32_0 = arith.constant 0 : i32
    %c0_i32_1 = arith.constant 0 : i32
    %c0_i32_2 = arith.constant 0 : i32
    return %c0_i32, %c0_i32_0, %c0_i32_1 : i32, i32, i32
  }
  func.func @transform_6(%arg0: i32) -> (i32, i32, i32) {
    %c0_i32 = arith.constant 0 : i32
    %c0_i32_0 = arith.constant 0 : i32
    %c0_i32_1 = arith.constant 0 : i32
    %c0_i32_2 = arith.constant 0 : i32
    return %c0_i32, %c0_i32_0, %c0_i32_1 : i32, i32, i32
  }
  func.func @transform_7(%arg0: i32) -> (i32, i32, i32) {
    %c0_i32 = arith.constant 0 : i32
    %c0_i32_0 = arith.constant 0 : i32
    %c0_i32_1 = arith.constant 0 : i32
    %c0_i32_2 = arith.constant 0 : i32
    return %c0_i32, %c0_i32_0, %c0_i32_1 : i32, i32, i32
  }
  func.func @transform_8(%arg0: i32) -> (i32, i32, i32) {
    %c0_i32 = arith.constant 0 : i32
    %c0_i32_0 = arith.constant 0 : i32
    %c0_i32_1 = arith.constant 0 : i32
    %c0_i32_2 = arith.constant 0 : i32
    return %c0_i32, %c0_i32_0, %c0_i32_1 : i32, i32, i32
  }
  func.func @transform_9(%arg0: i32) -> (i32, i32, i32) {
    %c0_i32 = arith.constant 0 : i32
    %c0_i32_0 = arith.constant 0 : i32
    %c0_i32_1 = arith.constant 0 : i32
    return %arg0, %c0_i32, %c0_i32_0 : i32, i32, i32
  }
}

</mosaic_0001>

<bundles_post_ra>
// kernel: tpu_custom_call.1
= control target key start
LH: loop header
LB: loop body
LE: loop exit
PB: predicated region body
PF: predicated region fallthrough
CT: control target
= control target key end

     0   :  { %s3388_s0 = inlined_call_operand.hbm [shape: f32[2,8,32], index: 0, kind: input, shape index: {}]   ;;  %s3389_s1 = inlined_call_operand.hbm [shape: f32[2,32,128], index: 1, kind: input, shape index: {}]   ;;  %s3390_s2 = inlined_call_operand.hbm [shape: f32[2,32,128], index: 2, kind: input, shape index: {}]   ;;  %s3391_s3 = inlined_call_operand.hbm [shape: f32[2,1,128], index: 3, kind: input, shape index: {}]   ;;  %s3392_s4 = inlined_call_operand.hbm [shape: f32[2,32,128], index: 4, kind: input, shape index: {}]   ;;  %s3393_s5 = inlined_call_operand.hbm [shape: f32[2,32,128], index: 5, kind: input, shape index: {}]   ;;  %s3394_s6 = inlined_call_operand.hbm [shape: f32[2,1,128], index: 6, kind: input, shape index: {}]   ;;  %s3395_s7 = inlined_call_operand.hbm [shape: f32[2,64,32], index: 7, kind: input, shape index: {}]   ;;  %s3396_s8 = inlined_call_operand.hbm [shape: f32[2,1,32], index: 8, kind: input, shape index: {}]   ;;  %s3397_s9 = inlined_call_operand.hbm [shape: f32[2,8,32], index: 9, kind: output, shape index: {}]  }
   0x1   :  { %3408 = sst [smem:[#allocation30_spill]] %s3389_s1 }
   0x2   :  { %3409 = sst [smem:[#allocation31_spill]] %s3397_s9 }
   0x3   :  { %14 = vsyncpa [#allocation9], 0 }
   0x4   :  { %16 = vsyncpa [#allocation9 + $0x1], 0 }
   0x5   :  { %17 = vsyncpa [#allocation12], 0 }
   0x6   :  { %18 = vsyncpa [#allocation15], 0 }
   0x7   :  { %19 = vsyncpa [#allocation18], 0 }
   0x8   :  { %20 = vsyncpa [#allocation21], 0 }
   0x9   :  { %21 = vsyncpa [#allocation10], 0 }
   0xa   :  { %23 = vsyncpa [#allocation10 + $0x1], 0  ;;  %s2875_s30 = smov 0   ;;  %s2877_s10 = smov 0  }
   0xb   :  { %s2879_s11 = smov 0   ;;  %s2881_s12 = smov 0  }
   0xc LB: > { %s2784_s13 = smov [#allocation11]   ;;  %s2896_s15 = sadd.s32 4294967295, %s2766_s12   ;;  %s2766_s12 = sphi %s2881_s12, %s3439_s12   ;;  %s2762_s11 = sphi %s2879_s11, %s3438_s11   ;;  %s2758_s10 = sphi %s2877_s10, %s3437_s10   ;;  %s2754_s30 = sphi %s2875_s30, %s3436_s30  }
   0xd   : > { %s266_s14 = sshll.u32 %s2784_s13, 4  ;;  %p1875_p0 = scmp.ge.s32.totalorder %s2766_s12, 1  ;;  %s2901_s14 = int_to_ptr.vmem [resolvable:$true] %s266_s14 }
   0xe   : > { %p3401_p1 = scmp.eq.s32.totalorder %s2896_s15, 0  ;;  %p254_p2 = scmp.lt.s32.totalorder %s2766_s12, 3 }
   0xf   : > { %s2785_s17 = smov [#allocation14]   ;;  %s2786_s20 = smov [#allocation17]  }
  0x10   : > { %p2903_p3 = pnand %p1875_p0, %p254_p2  ;;  %s292_s18 = sshll.u32 %s2785_s17, 4  ;;  %s2916_s18 = int_to_ptr.vmem [resolvable:$true] %s292_s18 }
  0x11   : > { %s2918_s21 = sshll.u32 %s2786_s20, 4  ;;  %s3412_s1 = sld [smem:[#allocation30_spill]]  ;;  %s319_s21 = int_to_ptr.vmem [resolvable:$true] %s2918_s21 }
  0x12   : > { %s3410_s16 = scalar_select %p2903_p3, 1, 0 }
  0x13   : > { %p2228_p5 = pneg %p2903_p3 }
  0x15   : > { %p2912_p6 = pnand %p2228_p5, %p3401_p1 }
  0x17   : > { %s2414_s24 = scalar_lea.hbm %s3412_s1, 1024  ;;  %p2928_p8 = pneg %p2912_p6 }
  0x18   : > { %p2415_p7 = scmp.ne.s32.totalorder %s3412_s1, %s2414_s24  ;;  %p2421_p11 = scmp.lt.u32.totalorder %s2414_s24, %s3412_s1 }
  0x1a   : > { %p2417_p9 = pnand %p2928_p8, %p2415_p7 }
  0x1c   : > { %p2418_p10 = pneg %p2417_p9 }
  0x1e   : > { %p2423_p12 = pnand %p2421_p11, %p2418_p10 }
  0x20   : > { %2426 = shalt.err (!%p2423_p12)
}
  0x21   : > { %s2427_s13 = scalar_lea.vmem %s2901_s14, 1024  ;;  %p2435_p5 = scmp.lt.s32.totalorder %s2901_s14, %s2901_s14 }
  0x22   : > { %p2428_p13 = scmp.ne.s32.totalorder %s2901_s14, %s2427_s13  ;;  %p2436_p4 = scmp.lt.s32.totalorder %s2427_s13, %s2427_s13 }
  0x24   : > { %p2430_p0 = pnand %p2428_p13, %p2928_p8  ;;  %p2437_p7 = por %p2436_p4, %p2435_p5 }
  0x26   : > { %p2431_p2 = pneg %p2430_p0 }
  0x28   : > { %p2438_p9 = pnand %p2437_p7, %p2431_p2 }
  0x2a   : > { %2441 = shalt.err (!%p2438_p9)
}
  0x2b   : > { %s3399_s17 = smov 128   ;;  %s2788_s20 = smov 8  }
  0x2c   : > { %2231 = dma.hbm_to_vmem [thread:$0]  (!%p2912_p6), %s3412_s1, 1024, %s2901_s14, [#allocation12], %s3399_s17, %s3399_s17, %s2788_s20  }
  0x2d   : > { %s2442_s26 = scalar_lea.hbm %s3391_s3, 32 }
  0x2e   : > { %p2443_p4 = scmp.ne.s32.totalorder %s3391_s3, %s2442_s26  ;;  %p2449_p12 = scmp.lt.u32.totalorder %s2442_s26, %s3391_s3 }
  0x30   : > { %p2445_p10 = pnand %p2443_p4, %p2928_p8 }
  0x32   : > { %p2446_p11 = pneg %p2445_p10 }
  0x34   : > { %p2451_p13 = pnand %p2449_p12, %p2446_p11 }
  0x36   : > { %2454 = shalt.err (!%p2451_p13)
}
  0x37   : > { %s2455_s14 = scalar_lea.vmem %s2916_s18, 32  ;;  %p2463_p7 = scmp.lt.s32.totalorder %s2916_s18, %s2916_s18 }
  0x38   : > { %p2456_p0 = scmp.ne.s32.totalorder %s2916_s18, %s2455_s14  ;;  %p2464_p9 = scmp.lt.s32.totalorder %s2455_s14, %s2455_s14 }
  0x3a   : > { %p2458_p2 = pnand %p2456_p0, %p2928_p8  ;;  %p2465_p4 = por %p2464_p9, %p2463_p7 }
  0x3c   : > { %p2459_p5 = pneg %p2458_p2 }
  0x3e   : > { %p2466_p10 = pnand %p2465_p4, %p2459_p5 }
  0x40   : > { %2469 = shalt.err (!%p2466_p10)
}
  0x41   : > { %s3403_s22 = smov 16   ;;  %s3405_s9 = smov 1  }
  0x42   : > { %2237 = dma.hbm_to_vmem [thread:$0]  (!%p2912_p6), %s3391_s3, 32, %s2916_s18, [#allocation15], %s3403_s22, %s3403_s22, %s3405_s9  }
  0x43   : > { %s2470_s28 = scalar_lea.hbm %s3393_s5, 1024 }
  0x44   : > { %p2471_p11 = scmp.ne.s32.totalorder %s3393_s5, %s2470_s28  ;;  %p2477_p0 = scmp.lt.u32.totalorder %s2470_s28, %s3393_s5 }
  0x46   : > { %p2473_p12 = pnand %p2471_p11, %p2928_p8 }
  0x48   : > { %p2474_p13 = pneg %p2473_p12 }
  0x4a   : > { %p2479_p2 = pnand %p2477_p0, %p2474_p13 }
  0x4c   : > { %2482 = shalt.err (!%p2479_p2)
}
  0x4d   : > { %s2483_s23 = scalar_lea.vmem %s319_s21, 1024  ;;  %p2491_p4 = scmp.lt.s32.totalorder %s319_s21, %s319_s21 }
  0x4e   : > { %p2484_p5 = scmp.ne.s32.totalorder %s319_s21, %s2483_s23  ;;  %p2492_p10 = scmp.lt.s32.totalorder %s2483_s23, %s2483_s23 }
  0x50   : > { %p2486_p7 = pnand %p2484_p5, %p2928_p8  ;;  %p2493_p1 = por %p2492_p10, %p2491_p4 }
  0x52   : > { %p2487_p9 = pneg %p2486_p7 }
  0x54   : > { %p2494_p3 = pnand %p2493_p1, %p2487_p9 }
  0x56   : > { %2497 = shalt.err (!%p2494_p3)
}
  0x57   : > { %s3414_s18 = smov 128   ;;  %s2791_s25 = smov [#allocation20]  }
  0x58   : > { %2243 = dma.hbm_to_vmem [thread:$0]  (!%p2912_p6), %s3393_s5, 1024, %s319_s21, [#allocation18], %s3414_s18, %s3414_s18, %s2788_s20  }
  0x59   : > { %s344_s26 = sshll.u32 %s2791_s25, 4  ;;  %s2792_s28 = smov [#allocation13]   ;;  %s345_s26 = int_to_ptr.vmem [resolvable:$true] %s344_s26 }
  0x5a   : > { %s279_s29 = sshll.u32 %s2792_s28, 4  ;;  %s2498_s23 = scalar_lea.hbm %s3395_s7, 2048  ;;  %s280_s29 = int_to_ptr.vmem [resolvable:$true] %s279_s29 }
  0x5b   : > { %p2499_p1 = scmp.ne.s32.totalorder %s3395_s7, %s2498_s23  ;;  %p2505_p12 = scmp.lt.u32.totalorder %s2498_s23, %s3395_s7 }
  0x5d   : > { %p2501_p3 = pnand %p2499_p1, %p2928_p8 }
  0x5f   : > { %p2502_p11 = pneg %p2501_p3 }
  0x61   : > { %p2507_p13 = pnand %p2505_p12, %p2502_p11 }
  0x63   : > { %2510 = shalt.err (!%p2507_p13)
}
  0x64   : > { %s2511_s21 = scalar_lea.vmem %s345_s26, 2048  ;;  %p2519_p7 = scmp.lt.s32.totalorder %s345_s26, %s345_s26 }
  0x65   : > { %p2512_p0 = scmp.ne.s32.totalorder %s345_s26, %s2511_s21  ;;  %p2520_p9 = scmp.lt.s32.totalorder %s2511_s21, %s2511_s21 }
  0x67   : > { %p2514_p2 = pnand %p2512_p0, %p2928_p8  ;;  %p2521_p4 = por %p2520_p9, %p2519_p7 }
  0x69   : > { %p2515_p5 = pneg %p2514_p2 }
  0x6b   : > { %p2522_p10 = pnand %p2521_p4, %p2515_p5 }
  0x6d   : > { %2525 = shalt.err (!%p2522_p10)
}
  0x6e   : > { %2249 = dma.hbm_to_vmem [thread:$0]  (!%p2912_p6), %s3395_s7, 2048, %s345_s26, [#allocation21], %s3414_s18, %s3414_s18, %s2788_s20  }
  0x6f   : > { %s2526_s25 = scalar_lea.hbm %s3390_s2, 1024 }
  0x70   : > { %p2527_p1 = scmp.ne.s32.totalorder %s3390_s2, %s2526_s25  ;;  %p2533_p12 = scmp.lt.u32.totalorder %s2526_s25, %s3390_s2 }
  0x72   : > { %p2529_p3 = pnand %p2527_p1, %p2928_p8 }
  0x74   : > { %p2530_p11 = pneg %p2529_p3 }
  0x76   : > { %p2535_p13 = pnand %p2533_p12, %p2530_p11 }
  0x78   : > { %2538 = shalt.err (!%p2535_p13)
}
  0x79   : > { %s2539_s17 = scalar_lea.vmem %s280_s29, 1024  ;;  %p2547_p7 = scmp.lt.s32.totalorder %s280_s29, %s280_s29 }
  0x7a   : > { %p2540_p0 = scmp.ne.s32.totalorder %s280_s29, %s2539_s17  ;;  %p2548_p9 = scmp.lt.s32.totalorder %s2539_s17, %s2539_s17 }
  0x7c   : > { %p2542_p2 = pnand %p2540_p0, %p2928_p8  ;;  %p2549_p4 = por %p2548_p9, %p2547_p7 }
  0x7e   : > { %p2543_p5 = pneg %p2542_p2 }
  0x80   : > { %p2550_p10 = pnand %p2549_p4, %p2543_p5 }
  0x82   : > { %2553 = shalt.err (!%p2550_p10)
}
  0x83   : > { %2234 = dma.hbm_to_vmem [thread:$0]  (!%p2912_p6), %s3390_s2, 1024, %s280_s29, [#allocation12], %s3414_s18, %s3414_s18, %s2788_s20  }
  0x84   : > { %s2793_s1 = smov [#allocation16]   ;;  %s2794_s9 = smov [#allocation19]  }
  0x85   : > { %s305_s22 = sshll.u32 %s2793_s1, 4  ;;  %s331_s24 = sshll.u32 %s2794_s9, 4  ;;  %s306_s22 = int_to_ptr.vmem [resolvable:$true] %s305_s22  ;;  %s332_s24 = int_to_ptr.vmem [resolvable:$true] %s331_s24 }
  0x86   : > { %s2554_s13 = scalar_lea.hbm %s3392_s4, 1024 }
  0x87   : > { %p2555_p1 = scmp.ne.s32.totalorder %s3392_s4, %s2554_s13  ;;  %p2561_p12 = scmp.lt.u32.totalorder %s2554_s13, %s3392_s4 }
  0x89   : > { %p2557_p3 = pnand %p2555_p1, %p2928_p8 }
  0x8b   : > { %p2558_p11 = pneg %p2557_p3 }
  0x8d   : > { %p2563_p13 = pnand %p2561_p12, %p2558_p11 }
  0x8f   : > { %2566 = shalt.err (!%p2563_p13)
}
  0x90   : > { %s2567_s29 = scalar_lea.vmem %s306_s22, 1024  ;;  %p2575_p7 = scmp.lt.s32.totalorder %s306_s22, %s306_s22 }
  0x91   : > { %p2568_p0 = scmp.ne.s32.totalorder %s306_s22, %s2567_s29  ;;  %p2576_p9 = scmp.lt.s32.totalorder %s2567_s29, %s2567_s29 }
  0x93   : > { %p2570_p2 = pnand %p2568_p0, %p2928_p8  ;;  %p2577_p4 = por %p2576_p9, %p2575_p7 }
  0x95   : > { %p2571_p5 = pneg %p2570_p2 }
  0x97   : > { %p2578_p10 = pnand %p2577_p4, %p2571_p5 }
  0x99   : > { %2581 = shalt.err (!%p2578_p10)
}
  0x9a   : > { %2240 = dma.hbm_to_vmem [thread:$0]  (!%p2912_p6), %s3392_s4, 1024, %s306_s22, [#allocation15], %s3414_s18, %s3414_s18, %s2788_s20  }
  0x9b   : > { %s2582_s28 = scalar_lea.hbm %s3394_s6, 32 }
  0x9c   : > { %p2583_p1 = scmp.ne.s32.totalorder %s3394_s6, %s2582_s28  ;;  %p2589_p12 = scmp.lt.u32.totalorder %s2582_s28, %s3394_s6 }
  0x9e   : > { %p2585_p3 = pnand %p2583_p1, %p2928_p8 }
  0xa0   : > { %p2586_p11 = pneg %p2585_p3 }
  0xa2   : > { %p2591_p13 = pnand %p2589_p12, %p2586_p11 }
  0xa4   : > { %2594 = shalt.err (!%p2591_p13)
}
  0xa5   : > { %s2595_s26 = scalar_lea.vmem %s332_s24, 32  ;;  %p2603_p7 = scmp.lt.s32.totalorder %s332_s24, %s332_s24 }
  0xa6   : > { %p2596_p0 = scmp.ne.s32.totalorder %s332_s24, %s2595_s26  ;;  %p2604_p9 = scmp.lt.s32.totalorder %s2595_s26, %s2595_s26 }
  0xa8   : > { %p2598_p2 = pnand %p2596_p0, %p2928_p8  ;;  %p2605_p4 = por %p2604_p9, %p2603_p7 }
  0xaa   : > { %p2599_p5 = pneg %p2598_p2 }
  0xac   : > { %p2606_p10 = pnand %p2605_p4, %p2599_p5 }
  0xae   : > { %2609 = shalt.err (!%p2606_p10)
}
  0xaf   : > { %s3415_s20 = smov 1   ;;  %s3416_s18 = smov 16  }
  0xb0   : > { %2246 = dma.hbm_to_vmem [thread:$0]  (!%p2912_p6), %s3394_s6, 32, %s332_s24, [#allocation18], %s3416_s18, %s3416_s18, %s3415_s20  }
  0xb1   : > { %s2795_s21 = smov [#allocation22]   ;;  %s2610_s28 = scalar_lea.hbm %s3396_s8, 32 }
  0xb2   : > { %s357_s1 = sshll.u32 %s2795_s21, 4  ;;  %p2611_p1 = scmp.ne.s32.totalorder %s3396_s8, %s2610_s28  ;;  %s358_s1 = int_to_ptr.vmem [resolvable:$true] %s357_s1 }
  0xb3   : > { %p2617_p12 = scmp.lt.u32.totalorder %s2610_s28, %s3396_s8 }
  0xb4   : > { %p2613_p3 = pnand %p2611_p1, %p2928_p8 }
  0xb6   : > { %p2614_p11 = pneg %p2613_p3 }
  0xb8   : > { %p2619_p13 = pnand %p2617_p12, %p2614_p11 }
  0xba   : > { %2622 = shalt.err (!%p2619_p13)
}
  0xbb   : > { %s2623_s24 = scalar_lea.vmem %s358_s1, 32  ;;  %p2631_p7 = scmp.lt.s32.totalorder %s358_s1, %s358_s1 }
  0xbc   : > { %p2624_p0 = scmp.ne.s32.totalorder %s358_s1, %s2623_s24  ;;  %p2632_p9 = scmp.lt.s32.totalorder %s2623_s24, %s2623_s24 }
  0xbe   : > { %p2626_p2 = pnand %p2624_p0, %p2928_p8  ;;  %p2633_p4 = por %p2632_p9, %p2631_p7 }
  0xc0   : > { %p2627_p5 = pneg %p2626_p2 }
  0xc2   : > { %p2634_p10 = pnand %p2633_p4, %p2627_p5 }
  0xc4   : > { %2637 = shalt.err (!%p2634_p10)
}
  0xc5   : > { %2252 = dma.hbm_to_vmem [thread:$0]  (!%p2912_p6), %s3396_s8, 32, %s358_s1, [#allocation21], %s3416_s18, %s3416_s18, %s3415_s20  }
  0xc6   : > { %s1874_s19 = sadd.s32 4294967294, %s2766_s12   ;;  %s3107_s27 = sadd.s32 1, %s2766_s12  }
  0xc7   : > { %s33_s29 = ssub.s32 %s2766_s12, %s3107_s27  ;;  %s36_s21 = sadd.s32 1, %s2762_s11 }
  0xc8   : > { %p34_p8 = scmp.eq.s32.totalorder %s33_s29, 0  ;;  %p43_p1 = scmp.ne.s32.totalorder %s2762_s11, %s2758_s10 }
  0xc9   : > { %p44_p3 = scmp.eq.s32.totalorder %s2766_s12, 0  ;;  %p49_p11 = scmp.ne.s32.totalorder %s2758_s10, %s2754_s30 }
  0xca   : > { %s3118_s9 = scalar_select %p34_p8, %s2762_s11, %s36_s21  }
  0xcb   : > { %p3120_p12 = por %p44_p3, %p43_p1  ;;  %p3418_p13 = scmp.eq.s32.totalorder %s2896_s15, 0 }
  0xcc   : > { %p241_p0 = scmp.eq.s32.totalorder %s2896_s15, 1  ;;  %p247_p2 = scmp.eq.s32.totalorder %s1874_s19, 1 }
  0xcd   : > { %p3126_p6 = por %p3418_p13, %p49_p11  ;;  %p2269_p5 = scmp.lt.s32.totalorder %s2766_s12, 2 }
  0xce   : > { %s371_s18 = sand.u32 1, %s2762_s11   ;;  %p3133_p7 = por %p241_p0, %p43_p1 }
  0xcf   : > { %p3137_p9 = por %p247_p2, %p49_p11  ;;  %s1885_s13 = sshll.u32 %s371_s18, 3 }
  0xd0   : > { %s3420_s1 = scalar_select %p3133_p7, 1, 0 }
  0xd1   : > { %s3421_s28 = scalar_select %p3137_p9, 1, 0 }
  0xd2   : > { %s1886_s14 = sshll.u32 %s2766_s12, 7  ;;  %s375_s26 = scalar_lea.vmem [#allocation8], %s1885_s13 }
  0xd3   : > { %s3145_s24 = scalar_lea.hbm %s3388_s0, %s1886_s14  ;;  %s382_s22 = sshll.u32 %s375_s26, 4  ;;  %s3147_s22 = int_to_ptr.vmem [resolvable:$true] %s382_s22 }
  0xd4   : > { %p3151_p4 = pnand %p2269_p5, %p3120_p12  ;;  %s372_s29 = scalar_lea.sflag [#allocation9], %s371_s18 }
  0xd5   : > { %s2638_s21 = scalar_lea.hbm %s3145_s24, 128  ;;  %s2643_s23 = scalar_lea.hbm %s3388_s0, 256 }
  0xd6   : > { %p2639_p10 = scmp.ne.s32.totalorder %s3145_s24, %s2638_s21  ;;  %p2640_p8 = pneg %p3151_p4 }
  0xd7   : > { %p2644_p11 = scmp.lt.u32.totalorder %s3145_s24, %s3388_s0  ;;  %p2645_p12 = scmp.lt.u32.totalorder %s2643_s23, %s2638_s21 }
  0xd8   : > { %p2641_p1 = pnand %p2640_p8, %p2639_p10  ;;  %p2647_p0 = scmp.lt.u32.totalorder %s2638_s21, %s3145_s24 }
  0xd9   : > { %p2646_p13 = por %p2645_p12, %p2644_p11 }
  0xda   : > { %p2642_p3 = pneg %p2641_p1 }
  0xdb   : > { %p2648_p2 = por %p2647_p0, %p2646_p13 }
  0xdd   : > { %p2649_p5 = pnand %p2648_p2, %p2642_p3 }
  0xdf   : > { %2652 = shalt.err (!%p2649_p5)
}
  0xe0   : > { %s2653_s18 = scalar_lea.vmem %s3147_s22, 128  ;;  %s2796_s26 = smov [#allocation8]  }
  0xe1   : > { %p2654_p10 = scmp.ne.s32.totalorder %s3147_s22, %s2653_s18  ;;  %s2658_s13 = sshll.u32 %s2796_s26, 4  ;;  %s2659_s13 = int_to_ptr.vmem [resolvable:$false] %s2658_s13 }
  0xe2   : > { %s2660_s14 = scalar_lea.vmem %s2659_s13, 256  ;;  %p2661_p7 = scmp.lt.s32.totalorder %s3147_s22, %s2659_s13 }
  0xe3   : > { %p2656_p1 = pnand %p2654_p10, %p2640_p8  ;;  %p2662_p11 = scmp.lt.s32.totalorder %s2660_s14, %s2653_s18 }
  0xe5   : > { %p2657_p9 = pneg %p2656_p1  ;;  %p2663_p12 = por %p2662_p11, %p2661_p7 }
  0xe7   : > { %p2664_p13 = pnand %p2663_p12, %p2657_p9 }
  0xe9   : > { %2667 = shalt.err (!%p2664_p13)
}
  0xea   : > { %2256 = dma.hbm_to_vmem [thread:$0]  (!%p3151_p4), %s3145_s24, 128, %s3147_s22, %s372_s29  }
  0xeb   : > { %p3423_p3 = scmp.ne.s32.totalorder %s3410_s16, 0 }
  0xec   : > { %s3183_s21 = sand.u32 (!%p3423_p3), 1, %s2758_s10  }
  0xed   : > { %391 = sbr.rel (%p3423_p3) target bundleno = 4031 (0xfbf), region = 56  ;;  %s1888_s23 = sshll.u32 (!%p3423_p3), %s3183_s21, 3 }
  0xee   : > { %s394_s25 = scalar_lea.sflag (!%p3423_p3), [#allocation9], %s3183_s21  ;;  %s3189_s17 = scalar_lea.vmem (!%p3423_p3), [#allocation8], %s1888_s23 }
  0xf4   : > { %2729 = dma.done.wait (%p3126_p6), %s394_s25, 128  }
  0xf5   : > { %2731 = vsyncadd (%p3126_p6), %s394_s25, 4294967168  ;;  %p3424_p7 = scmp.eq.s32.totalorder %s2896_s15, 0 }
  0xf7   : > { %2733 = dma.done.wait (%p3424_p7), [#allocation12], 2048   ;;  %p3425_p9 = pmov %p3424_p7 }
  0xf8   : > { %p3426_p4 = pmov %p3424_p7 }
  0xf9   : > { %2735 = vsyncadd (%p3425_p9), [#allocation12], 4294965248 }
  0xfa   : > { %2737 = dma.done.wait (%p3426_p4), [#allocation15], 1056   ;;  %p3427_p8 = pmov %p3426_p4 }
  0xfb   : > { %p3428_p0 = pmov %p3426_p4 }
  0xfc   : > { %2739 = vsyncadd (%p3427_p8), [#allocation15], 4294966240 }
  0xfd   : > { %2741 = dma.done.wait (%p3428_p0), [#allocation18], 1056   ;;  %p3429_p2 = pmov %p3428_p0 }
  0xfe   : > { %p3430_p6 = pmov %p3428_p0 }
  0xff   : > { %2743 = vsyncadd (%p3429_p2), [#allocation18], 4294966240 }
 0x100   : > { %2745 = dma.done.wait (%p3430_p6), [#allocation21], 2080   ;;  %p3431_p5 = pmov %p3428_p0 }
 0x101   : > { %v2797_v0 = vmov 0.0|0.0   ;;  %vm635_vm0 = vcmask 253952   ;;  %vm2798_vm1 = vmmov 0   ;;  %v2799_v1 = vmov 0.0   ;;  %v468_v2 = vld [vmem:[#allocation11] sm:$0xff]  ;;  %v469_v3 = vld [vmem:[#allocation11 + $0x8] sm:$0xff] }
 0x102   : > { %2747 = vsyncadd (%p3431_p5), [#allocation21], 4294965216  ;;  %2120 = vmatprep.subr.bf16.mxu0 %v2797_v0  ;;  %2126 = vmatprep.subr.bf16.mxu1 %v2797_v0  ;;  %636 = vst.msk [vmem:[#allocation6] sm:$0x1] %vm635_vm0, %v2799_v1  ;;  %v553_v4 = vld [vmem:[#allocation16] sm:$0xff]  ;;  %vm465_vm2 = vcmask 261120   ;;  %v2121_v5 = vpack.c.bf16 %v469_v3, %v468_v2 }
 0x103   : > { %1996 = vmatprep.mubr.msk.f32.mxu0 %vm2798_vm1, %v2799_v1  ;;  %637 = vst.msk [vmem:[#allocation6 + $0x1] sm:$0x1] %vm635_vm0, %v2799_v1  ;;  %2007 = vmatprep.mubr.msk.f32.mxu1 %vm2798_vm1, %v2799_v1  ;;  %v554_v6 = vld [vmem:[#allocation16 + $0x8] sm:$0xff]  ;;  %v471_v8 = vld [vmem:[#allocation11 + $0x18] sm:$0xff]  ;;  %v1898_v16 = vld [vmem:[#allocation14] ss:$0 sm:$0xff] }
 0x104   : > { %v470_v7 = vld [vmem:[#allocation11 + $0x10] sm:$0xff]  ;;  %v2127_v9 = vpack.c.bf16 %v554_v6, %v553_v4  ;;  %v556_v11 = vld [vmem:[#allocation16 + $0x18] sm:$0xff]  ;;  %2122 = vmatpush3.bf16.msra.mxu0 %v2121_v5  ;;  %v1900_v17 = vld [vmem:[#allocation19] ss:$0 sm:$0xff]  ;;  %s3229_s16 = scalar_lea.vmem [#allocation23], %s1888_s23  ;;  %s3231_s20 = smov 0  }
 0x105   : > { %v555_v10 = vld [vmem:[#allocation16 + $0x10] sm:$0xff]  ;;  %v2124_v13 = vpack.c.bf16 %v471_v8, %v470_v7  ;;  %2123 = vmatprep.subr.bf16.mxu0 %v2797_v0 }
 0x106   : > { %v464_v12 = vld [vmem:[%s3189_s17] sm:$0xff]  ;;  %2128 = vmatpush3.bf16.msra.mxu1 %v2127_v9  ;;  %v2130_v14 = vpack.c.bf16 %v556_v11, %v555_v10 }
 0x107   : > { %466 = vst.msk [vmem:[#allocation7] sm:$0xff] %vm465_vm2, %v464_v12  ;;  %2129 = vmatprep.subr.bf16.mxu1 %v2797_v0 }
 0x108   : > { %2125 = vmatpush3.bf16.msra.mxu0 %v2124_v13 }
 0x10a   : > { %2131 = vmatpush3.bf16.msra.mxu1 %v2130_v14 }
 0x10e   : > { %v467_v15 = vld [vmem:[#allocation7] sm:$0xff] }
 0x10f   : > { %1997 = vmatmul.mubr.msk.f32.vlgmr.msra.gmra.mrb[0].mxu0 %vm465_vm2, %v467_v15  ;;  %2008 = vmatmul.mubr.msk.f32.vlgmr.msra.gmra.mrb[0].mxu1 %vm465_vm2, %v467_v15 }
 0x1e2   : > { %v548_v18 = vpop.f32.mrb[0].mxu0  ;;  %v630_v19 = vpop.f32.mrb[0].mxu1 }
 0x1e3   : > { %v549_v20 = vadd.f32 %v1898_v16, %v548_v18  ;;  %v631_v21 = vadd.f32 %v1900_v17, %v630_v19  ;;  %v1998_v22 = vpop.f32.mrb[1].mxu0  ;;  %v2009_v23 = vpop.f32.mrb[1].mxu1 }
 0x1e5   : > { %552 = vst [vmem:[#allocation2] sm:$0xff] %v549_v20  ;;  %634 = vst [vmem:[#allocation3] sm:$0xff] %v631_v21 }
 0x1e6 LB: >> { %v646_v24 = vld [vmem:[#allocation13] sm:$0xff]  ;;  %v647_v25 = vld [vmem:[#allocation13 + $0x8] sm:$0xff]  ;;  %v648_v26 = vld [vmem:[#allocation13 + $0x10] sm:$0xff]  ;;  %v2800_v27 = vmov 0.0|0.0   ;;  %vm2801_vm3 = vmmov 0   ;;  %v2802_v30 = vmov 0.0   ;;  %s2770_s20 = sphi %s3231_s20, %s643_s20  }
 0x1e7   : >> { %2132 = vmatprep.subr.bf16.mxu0 %v2800_v27  ;;  %v2133_v28 = vpack.c.bf16 %v647_v25, %v646_v24  ;;  %v649_v29 = vld [vmem:[#allocation13 + $0x18] sm:$0xff]  ;;  %2018 = vmatprep.mubr.msk.f32.mxu0 %vm2801_vm3, %v2802_v30  ;;  %v650_v32 = vld [vmem:[#allocation6] sm:$0x1]  ;;  %s644_s24 = scalar_lea.vmem [#allocation2], %s2770_s20  ;;  %s2803_s22 = smov 64  }
 0x1e8   : >> { %v2136_v31 = vpack.c.bf16 %v649_v29, %v648_v26  ;;  %v1904_v38 = vld [vmem:[#allocation6 + $0x1] ss:$0 sm:$0xff]  ;;  %s2804_s19 = smov 32   ;;  %s2805_s29 = smov 96  }
 0x1e9   : >> { %2134 = vmatpush3.bf16.msra.mxu0 %v2133_v28  ;;  %s769_s18 = scalar_lea.vmem [#allocation4], %s2770_s20  ;;  %s643_s20 = sadd.s32 1, %s2770_s20  }
 0x1ea   : >> { %2135 = vmatprep.subr.bf16.mxu0 %v2800_v27  ;;  %p640_p10 = scmp.ge.s32.totalorder %s643_s20, 8  }
 0x1eb   : > { %s3249_s26 = smov (%p640_p10), 0  }
 0x1ec   : >> { %v645_v33 = vld [vmem:[%s644_s24] sm:$0x1] }
 0x1ed   : >> { %2137 = vmatpush3.bf16.msra.mxu0 %v2136_v31 }
 0x1f0   : >> { %2019 = vmatmul.mubr.msk.f32.vlgmr.msra.gmra.mrb[0].mxu0 %vm465_vm2, %v650_v32 }
 0x2c3   : >> { %v720_v34 = vpop.f32.mrb[0].mxu0 }
 0x2c4   : >> { %v724_v35 = vadd.f32 %v720_v34, %v645_v33  ;;  %v2020_v36 = vpop.f32.mrb[1].mxu0 }
 0x2c6   : >> { %2382 = vtanh.f32 %v724_v35  ;;  %v1903_v39 = vmul.f32 -1.442695, %v724_v35 }
 0x2c8   : >> { %2384 = vpow2.f32 %v1903_v39 }
 0x2d0   : >> { %v2383_v37 = vpop.eup %2382 }
 0x2d1   : >> { %744 = vrot.lane.b32.xlu0 %v2383_v37, %s2803_s22 }
 0x2d2   : >> { %v2385_v40 = vpop.eup %2384 }
 0x2d3   : >> { %v728_v41 = vadd.f32 1.0, %v2385_v40 }
 0x2d5   : >> { %739 = vrot.lane.b32.xlu0 %v1904_v38, %s2804_s19  ;;  %2386 = vrcp.f32 %v728_v41 }
 0x2df   : >> { %v2387_v42 = vpop.eup %2386 }
 0x343   : >> { %v745_v43 = vpop.permute.xlu0 %744 }
 0x344   : >> { %v747_v44 = vmul.f32 %v2387_v42, %v745_v43 }
 0x346   : >> { %749 = vrot.lane.b32.xlu1 %v747_v44, %s2804_s19 }
 0x347   : >> { %v740_v45 = vpop.permute.xlu0 %739 }
 0x348   : >> { %v742_v46 = vmul.f32 %v2387_v42, %v740_v45 }
 0x3b8   : >> { %v750_v47 = vpop.permute.xlu1 %749 }
 0x3b9   : >> { %v752_v48 = vadd.f32 %v750_v47, %v742_v46 }
 0x3bb   : >> { %2388 = vtanh.f32 %v752_v48 }
 0x3c5   : >> { %v2389_v49 = vpop.eup %2388 }
 0x3c6   : >> { %755 = vrot.lane.b32.xlu1 %v2389_v49, %s2803_s22 }
 0x3ca   : >> { %765 = vrot.lane.b32.xlu1 %v752_v48, %s2805_s29 }
 0x438   : >> { %v756_v50 = vpop.permute.xlu1 %755 }
 0x439   : >> { %v758_v51 = vmul.f32 %v2387_v42, %v756_v50 }
 0x43b   : >> { %760 = vrot.lane.b32.xlu0 %v758_v51, %s2804_s19 }
 0x43c   : >> { %v766_v52 = vpop.permute.xlu1 %765 }
 0x43d   : >> { %768 = vst.msk [vmem:[#allocation6 + $0x1] sm:$0x1] %vm635_vm0, %v766_v52 }
 0x43e   : > { %772 = vst.msk [vmem:[#allocation6 + $0x1] sm:$0x1] (%p640_p10), %vm635_vm0, %v2799_v1 }
 0x4a8   : > { %642 = sbr.rel (!%p640_p10) target bundleno = 486 (0x1e6), region = 181 }
 0x4ad   : >> { %v761_v53 = vpop.permute.xlu0 %760 }
 0x4ae   : >> { %763 = vst.msk [vmem:[#allocation6] sm:$0x1] %vm635_vm0, %v761_v53  ;;  %770 = vst.msk [vmem:[%s769_s18] sm:$0x1] %vm635_vm0, %v761_v53 }
 0x4af   : > { %771 = vst.msk [vmem:[#allocation6] sm:$0x1] %vm635_vm0, %v2799_v1 }
 0x4b0 LB: >> { %v782_v54 = vld [vmem:[#allocation17] sm:$0xff]  ;;  %v783_v55 = vld [vmem:[#allocation17 + $0x8] sm:$0xff]  ;;  %v784_v56 = vld [vmem:[#allocation17 + $0x10] sm:$0xff]  ;;  %v2806_v57 = vmov 0.0|0.0   ;;  %vm2807_vm4 = vmmov 0   ;;  %v2808_v60 = vmov 0.0   ;;  %s2774_s26 = sphi %s3249_s26, %s778_s26  }
 0x4b1   : >> { %2138 = vmatprep.subr.bf16.mxu0 %v2806_v57  ;;  %v2139_v58 = vpack.c.bf16 %v783_v55, %v782_v54  ;;  %v785_v59 = vld [vmem:[#allocation17 + $0x18] sm:$0xff]  ;;  %2029 = vmatprep.mubr.msk.f32.mxu0 %vm2807_vm4, %v2808_v60  ;;  %s779_s13 = ssub.s32 7, %s2774_s26  ;;  %s2809_s23 = smov 64   ;;  %v1907_v6 = vld [vmem:[#allocation6 + $0x1] ss:$0 sm:$0xff] }
 0x4b2   : >> { %v2142_v61 = vpack.c.bf16 %v785_v59, %v784_v56  ;;  %s780_s14 = scalar_lea.vmem [#allocation3], %s779_s13  ;;  %s2810_s25 = smov 32  }
 0x4b3   : >> { %2140 = vmatpush3.bf16.msra.mxu0 %v2139_v58  ;;  %v781_v63 = vld [vmem:[%s780_s14] sm:$0x1]  ;;  %s2811_s17 = smov 96   ;;  %s905_s20 = scalar_lea.vmem [#allocation5], %s779_s13 }
 0x4b4   : >> { %2141 = vmatprep.subr.bf16.mxu0 %v2806_v57  ;;  %s778_s26 = sadd.s32 1, %s2774_s26  }
 0x4b5   : >> { %p775_p1 = scmp.ge.s32.totalorder %s778_s26, 8  }
 0x4b6   : >> { %v786_v62 = vld [vmem:[#allocation6] sm:$0x1]  ;;  %2150 = vmatprep.subr.bf16.mxu1 (%p775_p1), %v2797_v0  ;;  %v912_v23 = vld [vmem:[#allocation20 + $0x28] sm:$0xff] (%p775_p1)  ;;  %v913_v27 = vld [vmem:[#allocation20 + $0x30] sm:$0xff] (%p775_p1)  ;;  %2051 = vmatprep.mubr.msk.f32.mxu1 (%p775_p1), %vm2798_vm1, %v2799_v1  ;;  %s3291_s24 = smov (%p775_p1), 0  }
 0x4b7   : >> { %2143 = vmatpush3.bf16.msra.mxu0 %v2142_v61  ;;  %v911_v22 = vld [vmem:[#allocation20 + $0x20] sm:$0xff] (%p775_p1)  ;;  %v908_v26 = vld [vmem:[#allocation20 + $0x8] sm:$0xff] (%p775_p1)  ;;  %v914_v28 = vld [vmem:[#allocation20 + $0x38] sm:$0xff] (%p775_p1) }
 0x4b8   : > { %2144 = vmatprep.subr.bf16.mxu0 (%p775_p1), %v2797_v0  ;;  %v907_v24 = vld [vmem:[#allocation20] sm:$0xff] (%p775_p1)  ;;  %v2145_v25 = vpack.c.bf16 (%p775_p1), %v912_v23, %v911_v22  ;;  %v909_v30 = vld [vmem:[#allocation20 + $0x10] sm:$0xff] (%p775_p1)  ;;  %v910_v31 = vld [vmem:[#allocation20 + $0x18] sm:$0xff] (%p775_p1)  ;;  %v2148_v32 = vpack.c.bf16 (%p775_p1), %v914_v28, %v913_v27 }
 0x4b9   : > { %v2151_v29 = vpack.c.bf16 (%p775_p1), %v908_v26, %v907_v24  ;;  %v2154_v33 = vpack.c.bf16 (%p775_p1), %v910_v31, %v909_v30  ;;  %v915_v35 = vld [vmem:[#allocation4] sm:$0xff] (%p775_p1)  ;;  %v1074_v36 = vld [vmem:[#allocation11 + $0x20] sm:$0xff] (%p775_p1)  ;;  %v1075_v37 = vld [vmem:[#allocation11 + $0x28] sm:$0xff] (%p775_p1) }
 0x4ba   : >> { %2030 = vmatmul.mubr.msk.f32.vlgmr.msra.gmra.mrb[0].mxu0 %vm465_vm2, %v786_v62  ;;  %v1161_v38 = vld [vmem:[#allocation16 + $0x20] sm:$0xff] (%p775_p1)  ;;  %v2157_v39 = vpack.c.bf16 (%p775_p1), %v1075_v37, %v1074_v36  ;;  %v1162_v40 = vld [vmem:[#allocation16 + $0x28] sm:$0xff] (%p775_p1)  ;;  %v1077_v43 = vld [vmem:[#allocation11 + $0x38] sm:$0xff] (%p775_p1) }
 0x4bb   : > { %2040 = vmatprep.mubr.msk.f32.mxu0 (%p775_p1), %vm2798_vm1, %v2799_v1  ;;  %2146 = vmatpush3.bf16.msra.mxu0 (%p775_p1), %v2145_v25  ;;  %v2163_v41 = vpack.c.bf16 (%p775_p1), %v1162_v40, %v1161_v38  ;;  %v1076_v42 = vld [vmem:[#allocation11 + $0x30] sm:$0xff] (%p775_p1)  ;;  %v1164_v46 = vld [vmem:[#allocation16 + $0x38] sm:$0xff] (%p775_p1)  ;;  %v1910_v50 = vld [vmem:[#allocation22] ss:$0 sm:$0xff] (%p775_p1) }
 0x4bc   : > { %2152 = vmatpush3.bf16.msra.mxu1 (%p775_p1), %v2151_v29  ;;  %2147 = vmatprep.subr.bf16.mxu0 (%p775_p1), %v2797_v0  ;;  %v1163_v44 = vld [vmem:[#allocation16 + $0x30] sm:$0xff] (%p775_p1)  ;;  %v2160_v45 = vpack.c.bf16 (%p775_p1), %v1077_v43, %v1076_v42  ;;  %v1911_v56 = vld [vmem:[#allocation14 + $0x1] ss:$0 sm:$0xff] (%p775_p1)  ;;  %v1913_v57 = vld [vmem:[#allocation19 + $0x1] ss:$0 sm:$0xff] (%p775_p1) }
 0x4bd   : > { %2153 = vmatprep.subr.bf16.mxu1 (%p775_p1), %v2797_v0  ;;  %v2166_v47 = vpack.c.bf16 (%p775_p1), %v1164_v46, %v1163_v44 }
 0x4bf   : > { %2149 = vmatpush3.bf16.msra.mxu0 (%p775_p1), %v2148_v32 }
 0x4c0   : > { %2155 = vmatpush3.bf16.msra.mxu1 (%p775_p1), %v2154_v33  ;;  %2156 = vmatprep.subr.bf16.mxu0 (%p775_p1), %v2797_v0 }
 0x4c1   : > { %2162 = vmatprep.subr.bf16.mxu1 (%p775_p1), %v2797_v0 }
 0x4c3   : > { %2052 = vmatmul.mubr.msk.f32.vlgmr.msra.gmra.mrb[0].mxu1 (%p775_p1), %vm465_vm2, %v915_v35 }
 0x4c4   : > { %2073 = vmatprep.mubr.msk.f32.mxu1 (%p775_p1), %vm2798_vm1, %v2799_v1  ;;  %2164 = vmatpush3.bf16.msra.mxu1 (%p775_p1), %v2163_v41 }
 0x4c5   : > { %2165 = vmatprep.subr.bf16.mxu1 (%p775_p1), %v2797_v0 }
 0x4c8   : > { %2167 = vmatpush3.bf16.msra.mxu1 (%p775_p1), %v2166_v47 }
 0x58d   : >> { %v856_v2 = vpop.f32.mrb[0].mxu0 }
 0x58e   : >> { %v860_v3 = vadd.f32 %v856_v2, %v781_v63  ;;  %v2031_v4 = vpop.f32.mrb[1].mxu0 }
 0x590   : >> { %2390 = vtanh.f32 %v860_v3  ;;  %v1906_v7 = vmul.f32 -1.442695, %v860_v3 }
 0x592   : >> { %2392 = vpow2.f32 %v1906_v7 }
 0x596   : > { %v1059_v49 = vpop.f32.mrb[0].mxu1 (%p775_p1) }
 0x597   : > { %v2053_v53 = vpop.f32.mrb[1].mxu1 (%p775_p1) }
 0x59a   : >> { %v2391_v5 = vpop.eup %2390 }
 0x59b   : >> { %880 = vrot.lane.b32.xlu0 %v2391_v5, %s2809_s23 }
 0x59c   : >> { %v2393_v8 = vpop.eup %2392 }
 0x59d   : >> { %v864_v9 = vadd.f32 1.0, %v2393_v8 }
 0x59f   : >> { %875 = vrot.lane.b32.xlu0 %v1907_v6, %s2810_s25  ;;  %2394 = vrcp.f32 %v864_v9 }
 0x5a9   : >> { %v2395_v10 = vpop.eup %2394 }
 0x60d   : >> { %v881_v11 = vpop.permute.xlu0 %880 }
 0x60e   : >> { %v883_v12 = vmul.f32 %v2395_v10, %v881_v11 }
 0x610   : >> { %885 = vrot.lane.b32.xlu1 %v883_v12, %s2810_s25 }
 0x611   : >> { %v876_v13 = vpop.permute.xlu0 %875 }
 0x612   : >> { %v878_v14 = vmul.f32 %v2395_v10, %v876_v13 }
 0x682   : >> { %v886_v15 = vpop.permute.xlu1 %885 }
 0x683   : >> { %v888_v16 = vadd.f32 %v886_v15, %v878_v14 }
 0x685   : >> { %2396 = vtanh.f32 %v888_v16 }
 0x68f   : >> { %v2397_v17 = vpop.eup %2396 }
 0x690   : >> { %891 = vrot.lane.b32.xlu1 %v2397_v17, %s2809_s23 }
 0x694   : >> { %901 = vrot.lane.b32.xlu1 %v888_v16, %s2811_s17 }
 0x702   : >> { %v892_v18 = vpop.permute.xlu1 %891 }
 0x703   : >> { %v894_v19 = vmul.f32 %v2395_v10, %v892_v18 }
 0x705   : >> { %896 = vrot.lane.b32.xlu0 %v894_v19, %s2810_s25 }
 0x706   : >> { %v902_v20 = vpop.permute.xlu1 %901 }
 0x707   : >> { %904 = vst.msk [vmem:[#allocation6 + $0x1] sm:$0x1] %vm635_vm0, %v902_v20 }
 0x708   : > { %1245 = vst.msk [vmem:[#allocation6 + $0x1] sm:$0x1] (%p775_p1), %vm635_vm0, %v2799_v1 }
 0x772   : > { %777 = sbr.rel (!%p775_p1) target bundleno = 1200 (0x4b0), region = 192 }
 0x777   : >> { %v897_v21 = vpop.permute.xlu0 %896 }
 0x778   : >> { %899 = vst.msk [vmem:[#allocation6] sm:$0x1] %vm635_vm0, %v897_v21  ;;  %906 = vst.msk [vmem:[%s905_s20] sm:$0x1] %vm635_vm0, %v897_v21 }
 0x779   : > { %1244 = vst.msk [vmem:[#allocation6] sm:$0x1] %vm635_vm0, %v2799_v1 }
 0x77f   : > { %v916_v34 = vld [vmem:[#allocation5] sm:$0xff] }
 0x780   : > { %2041 = vmatmul.mubr.msk.f32.vlgmr.msra.gmra.mrb[0].mxu0 %vm465_vm2, %v916_v34 }
 0x781   : > { %2062 = vmatprep.mubr.msk.f32.mxu0 %vm2798_vm1, %v2799_v1  ;;  %2158 = vmatpush3.bf16.msra.mxu0 %v2157_v39 }
 0x782   : > { %2159 = vmatprep.subr.bf16.mxu0 %v2797_v0 }
 0x785   : > { %2161 = vmatpush3.bf16.msra.mxu0 %v2160_v45 }
 0x853   : > { %v986_v48 = vpop.f32.mrb[0].mxu0 }
 0x854   : > { %v2042_v51 = vpop.f32.mrb[1].mxu0  ;;  %v1060_v52 = vadd.f32 %v1059_v49, %v986_v48 }
 0x856   : > { %v1070_v54 = vadd.f32 %v1910_v50, %v1060_v52 }
 0x858   : > { %1071 = vst.msk [vmem:[#allocation7] sm:$0xff] %vm465_vm2, %v1070_v54 }
 0x85f   : > { %v1072_v55 = vld [vmem:[#allocation7] sm:$0xff] }
 0x860   : > { %2063 = vmatmul.mubr.msk.f32.vlgmr.msra.gmra.mrb[2].mxu0 %vm465_vm2, %v1072_v55  ;;  %2074 = vmatmul.mubr.msk.f32.vlgmr.msra.gmra.mrb[2].mxu1 %vm465_vm2, %v1072_v55 }
 0x933   : > { %v1155_v58 = vpop.f32.mrb[2].mxu0  ;;  %v1239_v59 = vpop.f32.mrb[2].mxu1 }
 0x934   : > { %v1156_v60 = vadd.f32 %v1911_v56, %v1155_v58  ;;  %v1240_v61 = vadd.f32 %v1913_v57, %v1239_v59  ;;  %v2064_v62 = vpop.f32.mrb[3].mxu0  ;;  %v2075_v63 = vpop.f32.mrb[3].mxu1 }
 0x936   : > { %1159 = vst [vmem:[#allocation2] sm:$0xff] %v1156_v60  ;;  %1243 = vst [vmem:[#allocation3] sm:$0xff] %v1240_v61 }
 0x937 LB: >> { %v1255_v2 = vld [vmem:[#allocation13 + $0x20] sm:$0xff]  ;;  %v1256_v3 = vld [vmem:[#allocation13 + $0x28] sm:$0xff]  ;;  %v1257_v4 = vld [vmem:[#allocation13 + $0x30] sm:$0xff]  ;;  %v2812_v5 = vmov 0.0|0.0   ;;  %vm2813_vm5 = vmmov 0   ;;  %v2814_v8 = vmov 0.0   ;;  %s2778_s24 = sphi %s3291_s24, %s1251_s24  }
 0x938   : >> { %2168 = vmatprep.subr.bf16.mxu0 %v2812_v5  ;;  %v2169_v6 = vpack.c.bf16 %v1256_v3, %v1255_v2  ;;  %v1258_v7 = vld [vmem:[#allocation13 + $0x38] sm:$0xff]  ;;  %2084 = vmatprep.mubr.msk.f32.mxu0 %vm2813_vm5, %v2814_v8  ;;  %v1259_v10 = vld [vmem:[#allocation6] sm:$0x1]  ;;  %s1252_s22 = scalar_lea.vmem [#allocation2], %s2778_s24  ;;  %s2815_s19 = smov 64  }
 0x939   : >> { %v2172_v9 = vpack.c.bf16 %v1258_v7, %v1257_v4  ;;  %v1917_v16 = vld [vmem:[#allocation6 + $0x1] ss:$0 sm:$0xff]  ;;  %s2816_s29 = smov 32   ;;  %s2817_s18 = smov 96  }
 0x93a   : >> { %2170 = vmatpush3.bf16.msra.mxu0 %v2169_v6  ;;  %s1378_s26 = scalar_lea.vmem [#allocation4], %s2778_s24  ;;  %s1251_s24 = sadd.s32 1, %s2778_s24  }
 0x93b   : >> { %2171 = vmatprep.subr.bf16.mxu0 %v2812_v5  ;;  %p1248_p11 = scmp.ge.s32.totalorder %s1251_s24, 8  }
 0x93c   : > { %s3309_s13 = smov (%p1248_p11), 0  }
 0x93d   : >> { %v1253_v11 = vld [vmem:[%s1252_s22] sm:$0x1] }
 0x93e   : >> { %2173 = vmatpush3.bf16.msra.mxu0 %v2172_v9 }
 0x941   : >> { %2085 = vmatmul.mubr.msk.f32.vlgmr.msra.gmra.mrb[0].mxu0 %vm465_vm2, %v1259_v10 }
 0xa14   : >> { %v1329_v12 = vpop.f32.mrb[0].mxu0 }
 0xa15   : >> { %v1333_v13 = vadd.f32 %v1329_v12, %v1253_v11  ;;  %v2086_v14 = vpop.f32.mrb[1].mxu0 }
 0xa17   : >> { %2398 = vtanh.f32 %v1333_v13  ;;  %v1916_v17 = vmul.f32 -1.442695, %v1333_v13 }
 0xa19   : >> { %2400 = vpow2.f32 %v1916_v17 }
 0xa21   : >> { %v2399_v15 = vpop.eup %2398 }
 0xa22   : >> { %1353 = vrot.lane.b32.xlu0 %v2399_v15, %s2815_s19 }
 0xa23   : >> { %v2401_v18 = vpop.eup %2400 }
 0xa24   : >> { %v1337_v19 = vadd.f32 1.0, %v2401_v18 }
 0xa26   : >> { %1348 = vrot.lane.b32.xlu0 %v1917_v16, %s2816_s29  ;;  %2402 = vrcp.f32 %v1337_v19 }
 0xa30   : >> { %v2403_v20 = vpop.eup %2402 }
 0xa94   : >> { %v1354_v21 = vpop.permute.xlu0 %1353 }
 0xa95   : >> { %v1356_v22 = vmul.f32 %v2403_v20, %v1354_v21 }
 0xa97   : >> { %1358 = vrot.lane.b32.xlu1 %v1356_v22, %s2816_s29 }
 0xa98   : >> { %v1349_v23 = vpop.permute.xlu0 %1348 }
 0xa99   : >> { %v1351_v24 = vmul.f32 %v2403_v20, %v1349_v23 }
 0xb09   : >> { %v1359_v25 = vpop.permute.xlu1 %1358 }
 0xb0a   : >> { %v1361_v26 = vadd.f32 %v1359_v25, %v1351_v24 }
 0xb0c   : >> { %2404 = vtanh.f32 %v1361_v26 }
 0xb16   : >> { %v2405_v27 = vpop.eup %2404 }
 0xb17   : >> { %1364 = vrot.lane.b32.xlu1 %v2405_v27, %s2815_s19 }
 0xb1b   : >> { %1374 = vrot.lane.b32.xlu1 %v1361_v26, %s2817_s18 }
 0xb89   : >> { %v1365_v28 = vpop.permute.xlu1 %1364 }
 0xb8a   : >> { %v1367_v29 = vmul.f32 %v2403_v20, %v1365_v28 }
 0xb8c   : >> { %1369 = vrot.lane.b32.xlu0 %v1367_v29, %s2816_s29 }
 0xb8d   : >> { %v1375_v30 = vpop.permute.xlu1 %1374 }
 0xb8e   : >> { %1377 = vst.msk [vmem:[#allocation6 + $0x1] sm:$0x1] %vm635_vm0, %v1375_v30 }
 0xb8f   : > { %1381 = vst.msk [vmem:[#allocation6 + $0x1] sm:$0x1] (%p1248_p11), %vm635_vm0, %v2799_v1 }
 0xbf9   : > { %1250 = sbr.rel (!%p1248_p11) target bundleno = 2359 (0x937), region = 203 }
 0xbfe   : >> { %v1370_v31 = vpop.permute.xlu0 %1369 }
 0xbff   : >> { %1372 = vst.msk [vmem:[#allocation6] sm:$0x1] %vm635_vm0, %v1370_v31  ;;  %1379 = vst.msk [vmem:[%s1378_s26] sm:$0x1] %vm635_vm0, %v1370_v31 }
 0xc00   : > { %1380 = vst.msk [vmem:[#allocation6] sm:$0x1] %vm635_vm0, %v2799_v1 }
 0xc01 LB: >> { %v1392_v32 = vld [vmem:[#allocation17 + $0x20] sm:$0xff]  ;;  %v1393_v33 = vld [vmem:[#allocation17 + $0x28] sm:$0xff]  ;;  %v1394_v34 = vld [vmem:[#allocation17 + $0x30] sm:$0xff]  ;;  %v2818_v35 = vmov 0.0|0.0   ;;  %vm2819_vm6 = vmmov 0   ;;  %v2820_v38 = vmov 0.0   ;;  %s2782_s13 = sphi %s3309_s13, %s1387_s13  }
 0xc02   : >> { %2174 = vmatprep.subr.bf16.mxu0 %v2818_v35  ;;  %v2175_v36 = vpack.c.bf16 %v1393_v33, %v1392_v32  ;;  %v1395_v37 = vld [vmem:[#allocation17 + $0x38] sm:$0xff]  ;;  %2095 = vmatprep.mubr.msk.f32.mxu0 %vm2819_vm6, %v2820_v38  ;;  %s1388_s14 = ssub.s32 7, %s2782_s13  ;;  %s2821_s25 = smov 64   ;;  %v1920_v46 = vld [vmem:[#allocation6 + $0x1] ss:$0 sm:$0xff] }
 0xc03   : >> { %v2178_v39 = vpack.c.bf16 %v1395_v37, %v1394_v34  ;;  %s1389_s23 = scalar_lea.vmem [#allocation3], %s1388_s14  ;;  %s2822_s17 = smov 32  }
 0xc04   : >> { %2176 = vmatpush3.bf16.msra.mxu0 %v2175_v36  ;;  %v1390_v41 = vld [vmem:[%s1389_s23] sm:$0x1]  ;;  %s2823_s20 = smov 96   ;;  %s1515_s24 = scalar_lea.vmem [#allocation5], %s1388_s14 }
 0xc05   : >> { %2177 = vmatprep.subr.bf16.mxu0 %v2818_v35  ;;  %s1387_s13 = sadd.s32 1, %s2782_s13  }
 0xc06   : >> { %p1384_p12 = scmp.ge.s32.totalorder %s1387_s13, 8  }
 0xc07   : >> { %v1396_v40 = vld [vmem:[#allocation6] sm:$0x1]  ;;  %2186 = vmatprep.subr.bf16.mxu1 (%p1384_p12), %v2797_v0  ;;  %v1523_v63 = vld [vmem:[#allocation20 + $0x68] sm:$0xff] (%p1384_p12)  ;;  %v1524_v5 = vld [vmem:[#allocation20 + $0x70] sm:$0xff] (%p1384_p12)  ;;  %2117 = vmatprep.mubr.msk.f32.mxu1 (%p1384_p12), %vm2798_vm1, %v2799_v1  ;;  %s1925_s22 = sshll.u32 (%p1384_p12), %s2896_s15, 7  ;;  %s1700_s19 = sshll.u32 (%p1384_p12), %s3229_s16, 4  ;;  %s3344_s19 = int_to_ptr.vmem [resolvable:$true] %s1700_s19 }
 0xc08   : >> { %2179 = vmatpush3.bf16.msra.mxu0 %v2178_v39  ;;  %v1522_v62 = vld [vmem:[#allocation20 + $0x60] sm:$0xff] (%p1384_p12)  ;;  %v1519_v4 = vld [vmem:[#allocation20 + $0x48] sm:$0xff] (%p1384_p12)  ;;  %v1525_v6 = vld [vmem:[#allocation20 + $0x78] sm:$0xff] (%p1384_p12)  ;;  %s3432_s26 = sld [smem:[#allocation31_spill]] (%p1384_p12)  ;;  %s1687_s14 = scalar_lea.sflag (%p1384_p12), [#allocation10], %s3183_s21 }
 0xc09   : > { %2180 = vmatprep.subr.bf16.mxu0 (%p1384_p12), %v2797_v0  ;;  %v1518_v2 = vld [vmem:[#allocation20 + $0x40] sm:$0xff] (%p1384_p12)  ;;  %v2181_v3 = vpack.c.bf16 (%p1384_p12), %v1523_v63, %v1522_v62  ;;  %v1520_v8 = vld [vmem:[#allocation20 + $0x50] sm:$0xff] (%p1384_p12)  ;;  %v1521_v9 = vld [vmem:[#allocation20 + $0x58] sm:$0xff] (%p1384_p12)  ;;  %v2184_v10 = vpack.c.bf16 (%p1384_p12), %v1525_v6, %v1524_v5  ;;  %s2668_s23 = scalar_lea.vmem (%p1384_p12), %s3344_s19, 128  ;;  %p3433_p3 = scmp.ne.s32.totalorder (%p1384_p12), %s3420_s1, 0 }
 0xc0a   : > { %v2187_v7 = vpack.c.bf16 (%p1384_p12), %v1519_v4, %v1518_v2  ;;  %v2190_v11 = vpack.c.bf16 (%p1384_p12), %v1521_v9, %v1520_v8  ;;  %v1526_v13 = vld [vmem:[#allocation4] sm:$0xff] (%p1384_p12)  ;;  %v1923_v15 = vld [vmem:[#allocation22 + $0x1] ss:$0 sm:$0xff] (%p1384_p12)  ;;  %p2669_p13 = scmp.ne.s32.totalorder (%p1384_p12), %s3344_s19, %s2668_s23  ;;  %s2824_s15 = smov (%p1384_p12), [#allocation23]  }
 0xc0b   : >> { %2096 = vmatmul.mubr.msk.f32.vlgmr.msra.gmra.mrb[0].mxu0 %vm465_vm2, %v1396_v40 }
 0xc0c   : > { %2106 = vmatprep.mubr.msk.f32.mxu0 (%p1384_p12), %vm2798_vm1, %v2799_v1  ;;  %2182 = vmatpush3.bf16.msra.mxu0 (%p1384_p12), %v2181_v3  ;;  %p2670_p7 = pnand (%p1384_p12), %p2669_p13, %p3433_p3 }
 0xc0d   : > { %2188 = vmatpush3.bf16.msra.mxu1 (%p1384_p12), %v2187_v7  ;;  %2183 = vmatprep.subr.bf16.mxu0 (%p1384_p12), %v2797_v0 }
 0xc0e   : > { %2189 = vmatprep.subr.bf16.mxu1 (%p1384_p12), %v2797_v0  ;;  %s3342_s13 = scalar_lea.hbm (%p1384_p12), %s3432_s26, %s1925_s22  ;;  %p2671_p9 = pneg (%p1384_p12), %p2670_p7 }
 0xc10   : > { %2185 = vmatpush3.bf16.msra.mxu0 (%p1384_p12), %v2184_v10 }
 0xc11   : > { %2191 = vmatpush3.bf16.msra.mxu1 (%p1384_p12), %v2190_v11 }
 0xc14   : > { %2118 = vmatmul.mubr.msk.f32.vlgmr.msra.gmra.mrb[0].mxu1 (%p1384_p12), %vm465_vm2, %v1526_v13 }
 0xcde   : >> { %v1466_v42 = vpop.f32.mrb[0].mxu0 }
 0xcdf   : >> { %v1470_v43 = vadd.f32 %v1466_v42, %v1390_v41  ;;  %v2097_v44 = vpop.f32.mrb[1].mxu0 }
 0xce1   : >> { %2406 = vtanh.f32 %v1470_v43  ;;  %v1919_v47 = vmul.f32 -1.442695, %v1470_v43 }
 0xce3   : >> { %2408 = vpow2.f32 %v1919_v47 }
 0xce7   : > { %v1670_v14 = vpop.f32.mrb[0].mxu1 (%p1384_p12) }
 0xce8   : > { %v2119_v18 = vpop.f32.mrb[1].mxu1 (%p1384_p12) }
 0xceb   : >> { %v2407_v45 = vpop.eup %2406 }
 0xcec   : >> { %1490 = vrot.lane.b32.xlu0 %v2407_v45, %s2821_s25 }
 0xced   : >> { %v2409_v48 = vpop.eup %2408 }
 0xcee   : >> { %v1474_v49 = vadd.f32 1.0, %v2409_v48 }
 0xcf0   : >> { %1485 = vrot.lane.b32.xlu0 %v1920_v46, %s2822_s17  ;;  %2410 = vrcp.f32 %v1474_v49 }
 0xcfa   : >> { %v2411_v50 = vpop.eup %2410 }
 0xd5e   : >> { %v1491_v51 = vpop.permute.xlu0 %1490 }
 0xd5f   : >> { %v1493_v52 = vmul.f32 %v2411_v50, %v1491_v51 }
 0xd61   : >> { %1495 = vrot.lane.b32.xlu1 %v1493_v52, %s2822_s17 }
 0xd62   : >> { %v1486_v53 = vpop.permute.xlu0 %1485 }
 0xd63   : >> { %v1488_v54 = vmul.f32 %v2411_v50, %v1486_v53 }
 0xdd3   : >> { %v1496_v55 = vpop.permute.xlu1 %1495 }
 0xdd4   : >> { %v1498_v56 = vadd.f32 %v1496_v55, %v1488_v54 }
 0xdd6   : >> { %2412 = vtanh.f32 %v1498_v56 }
 0xde0   : >> { %v2413_v57 = vpop.eup %2412 }
 0xde1   : >> { %1501 = vrot.lane.b32.xlu1 %v2413_v57, %s2821_s25  ;;  %s2672_s25 = sshll.u32 (%p1384_p12), %s2824_s15, 4  ;;  %s2673_s25 = int_to_ptr.vmem [resolvable:$false] %s2672_s25 }
 0xde2   : > { %p2675_p4 = scmp.lt.s32.totalorder (%p1384_p12), %s3344_s19, %s2673_s25 }
 0xde5   : >> { %1511 = vrot.lane.b32.xlu1 %v1498_v56, %s2823_s20 }
 0xe53   : >> { %v1502_v58 = vpop.permute.xlu1 %1501 }
 0xe54   : >> { %v1504_v59 = vmul.f32 %v2411_v50, %v1502_v58 }
 0xe56   : >> { %1506 = vrot.lane.b32.xlu0 %v1504_v59, %s2822_s17  ;;  %s2674_s17 = scalar_lea.vmem (%p1384_p12), %s2673_s25, 256 }
 0xe57   : >> { %v1512_v60 = vpop.permute.xlu1 %1511  ;;  %p2676_p8 = scmp.lt.s32.totalorder (%p1384_p12), %s2674_s17, %s2668_s23 }
 0xe58   : >> { %1514 = vst.msk [vmem:[#allocation6 + $0x1] sm:$0x1] %vm635_vm0, %v1512_v60 }
 0xe59   : > { %p2677_p0 = por (%p1384_p12), %p2676_p8, %p2675_p4 }
 0xe5b   : > { %p2678_p2 = pnand (%p1384_p12), %p2677_p0, %p2671_p9 }
 0xec3   : > { %1386 = sbr.rel (!%p1384_p12) target bundleno = 3073 (0xc01), region = 214 }
 0xec8   : >> { %v1507_v61 = vpop.permute.xlu0 %1506 }
 0xec9   : >> { %1509 = vst.msk [vmem:[#allocation6] sm:$0x1] %vm635_vm0, %v1507_v61  ;;  %1516 = vst.msk [vmem:[%s1515_s24] sm:$0x1] %vm635_vm0, %v1507_v61 }
 0xed0   : > { %v1527_v12 = vld [vmem:[#allocation5] sm:$0xff] }
 0xed1   : > { %2107 = vmatmul.mubr.msk.f32.vlgmr.msra.gmra.mrb[0].mxu0 %vm465_vm2, %v1527_v12 }
 0xfa4   : > { %v1597_v1 = vpop.f32.mrb[0].mxu0 }
 0xfa5   : > { %v2108_v16 = vpop.f32.mrb[1].mxu0  ;;  %v1671_v17 = vadd.f32 %v1670_v14, %v1597_v1 }
 0xfa7   : > { %v1682_v19 = vadd.f32 %v1923_v15, %v1671_v17 }
 0xfa9   : > { %1683 = vst.msk [vmem:[#allocation7] sm:$0xff] %vm465_vm2, %v1682_v19 }
 0xfb0   : > { %v1684_v0 = vld [vmem:[#allocation7] sm:$0xff] }
 0xfb1   : > { %1685 = vst.msk [vmem:[%s3229_s16] sm:$0xff] %vm465_vm2, %v1684_v0 }
 0xfb2   : > { %2681 = shalt.err (!%p2678_p2)
}
 0xfb3   : > { %s2682_s21 = scalar_lea.hbm %s3342_s13, 128  ;;  %s2686_s24 = scalar_lea.hbm %s3432_s26, 256 }
 0xfb4   : > { %p2683_p6 = scmp.ne.s32.totalorder %s3342_s13, %s2682_s21  ;;  %p2687_p1 = scmp.lt.u32.totalorder %s3342_s13, %s3432_s26 }
 0xfb5   : > { %p2688_p11 = scmp.lt.u32.totalorder %s2686_s24, %s2682_s21  ;;  %p2690_p13 = scmp.lt.u32.totalorder %s2682_s21, %s3342_s13 }
 0xfb6   : > { %p2684_p5 = pnand %p2683_p6, %p3433_p3 }
 0xfb7   : > { %p2689_p12 = por %p2688_p11, %p2687_p1 }
 0xfb8   : > { %p2685_p10 = pneg %p2684_p5 }
 0xfb9   : > { %p2691_p7 = por %p2690_p13, %p2689_p12 }
 0xfbb   : > { %p2692_p9 = pnand %p2691_p7, %p2685_p10 }
 0xfbd   : > { %2695 = shalt.err (!%p2692_p9)
}
 0xfbe   : > { %2226 = dma.vmem_to_hbm [thread:$0]  (%p3433_p3), %s3344_s19, 128, %s3342_s13, %s1687_s14  }
 0xfbf PF: > { %s1712_s18 = sand.u32 1, %s2754_s30   ;;  %p3434_p4 = scmp.ne.s32.totalorder %s3421_s28, 0 }
 0xfc0   : > { %p3435_p8 = scmp.ge.s32.totalorder %s2766_s12, 2  ;;  %s1713_s23 = scalar_lea.sflag [#allocation10], %s1712_s18 }
 0xfc2   : > { %p2258_p0 = pnand %p3435_p8, %p3434_p4 }
 0xfc4   : > { %2749 = dma.done.wait (!%p2258_p0), %s1713_s23, 128  }
 0xfc5   : > { %2751 = vsyncadd (!%p2258_p0), %s1713_s23, 4294967168  ;;  %p26_p2 = scmp.ge.s32.totalorder %s3107_s27, 4   ;;  %s3436_s30 = smov %s2758_s10 }
 0xfc6   : > { %s3437_s10 = smov %s2762_s11  ;;  %s3438_s11 = smov %s3118_s9 }
 0xfc7   : > { %s3439_s12 = smov %s3107_s27  ;;  %28 = sbr.rel (!%p26_p2) target bundleno = 12 (0xc), region = 225 }
 0xfce   :  { %1718 = vsyncpa [#allocation9], 1 }
 0xfcf   :  { %1720 = vsyncpa [#allocation9 + $0x1], 1 }
 0xfd0   :  { %1721 = vsyncpa [#allocation12], 1 }
 0xfd1   :  { %1722 = vsyncpa [#allocation15], 1 }
 0xfd2   :  { %1723 = vsyncpa [#allocation18], 1 }
 0xfd3   :  { %1724 = vsyncpa [#allocation21], 1 }
 0xfd4   :  { %1725 = vsyncpa [#allocation10], 1 }
 0xfd5   :  { %1727 = vsyncpa [#allocation10 + $0x1], 1 }

</bundles_post_ra>
